<compile_context>
chip_gen: v7x
topology: tpu7x:2x2x1
jax: 0.10.0
libtpu: 0.0.40
codegen_flags: <defaults>
</compile_context>

<pallas_src>
import functools

import jax
import jax.numpy as jnp
from jax import lax
from jax.experimental import pallas as pl
from jax.experimental.pallas import tpu as pltpu


def _round_up(x, m):
    return ((x + m - 1) // m) * m


def _cdiv(a, b):
    return -(-a // b)


def _vmem_limit(need_bytes):
    # Raise the scoped-VMEM limit only when the tile needs it (v5e default is 16 MiB);
    # cap below v7x's 64 MiB physical VMEM.
    if need_bytes <= 12 * 1024 * 1024:
        return None
    return int(min(2 * need_bytes, 48 * 1024 * 1024))


# ------------------------------------------------------------------ kernels ---------
def _lut_kernel(tok_ref, m_ref, bc_ref, o_ref):
    """out[b, :] = sum_l onehot(tok[b, l]) @ M[l] + bc  (embedding+MLP folded into M)."""
    tb, n_pos = tok_ref.shape
    vpad = m_ref.shape[1]
    tok = tok_ref[...]                                           # (tb, L) int32
    v_iota = lax.broadcasted_iota(jnp.int32, (tb, vpad), 1)      # hoisted out of the loop
    o_ref[...] = jnp.broadcast_to(bc_ref[...], o_ref.shape)      # f32 bias init (v5e-safe)
    for l in range(n_pos):                                       # static unroll, L is small
        onehot = jnp.where(v_iota == tok[:, l:l + 1], 1.0, 0.0)  # (tb, vpad) f32, exact 0/1
        o_ref[...] += jnp.dot(onehot, m_ref[l],
                              preferred_element_type=jnp.float32,
                              precision=lax.Precision.DEFAULT)


def _folded_matmul_kernel(x_ref, wc_ref, bc_ref, o_ref):
    """Fallback: out = flat @ Wc + bc (activation gathered by XLA for large vocabularies)."""
    o_ref[...] = jnp.dot(x_ref[...], wc_ref[...],
                         preferred_element_type=jnp.float32,
                         precision=lax.Precision.DEFAULT) + bc_ref[...]


# ------------------------------------------------------------------ prep (one-time) --
def net_multi_prepare(emb_table, w1, b1, w2, b2, *, lut_budget_bytes=4 << 20):
    """One-time eval-mode fold of NetMulti parameters (Dropout == identity).

    Returns (params_pytree, num_classes). Not valid for the training path."""
    V, E = emb_table.shape
    _, K = w1.shape
    C = w2.shape[0]
    assert K % E == 0, "extradense in_features must equal embedding_dim * max_string_length"
    L = K // E
    f32 = jnp.float32
    cpad = _round_up(C, 128)

    # Linear -> Dropout(identity) -> Linear folds to one affine map, contracted directly
    # against the PyTorch (out, in) layouts (no materialized transposes).
    wc = lax.dot_general(w1.astype(f32), w2.astype(f32), (((0,), (1,)), ((), ())),
                         precision=lax.Precision.HIGHEST)                    # (K, C)
    bc = lax.dot_general(b1.astype(f32), w2.astype(f32), (((0,), (1,)), ((), ())),
                         precision=lax.Precision.HIGHEST) + b2.astype(f32)   # (C,)
    bc_p = jnp.pad(bc, (0, cpad - C)).reshape(1, cpad)

    vpad = _round_up(V, 128)
    lut_bytes = L * vpad * cpad * 4
    if lut_bytes <= lut_budget_bytes:
        # Fold the embedding in too: M[l, v, :] = emb[v, :] @ Wc[l*E:(l+1)*E, :].
        m = jnp.einsum("ve,lec->lvc", emb_table.astype(f32), wc.reshape(L, E, C),
                       precision=lax.Precision.HIGHEST)                      # (L, V, C)
        m_p = jnp.pad(m, ((0, 0), (0, vpad - V), (0, cpad - C)))             # (L, Vpad, Cpad)
        return {"lut": m_p, "bc": bc_p}, C
    # Large vocabulary: keep the plain folded weights and the embedding table.
    return {"wc": jnp.pad(wc, ((0, 0), (0, cpad - C))),                      # (K, Cpad)
            "bc": bc_p,
            "emb": emb_table.astype(f32)}, C


# ------------------------------------------------------------------ forward ----------
def _batch_tiling(batch, block_b, max_tile=4096):
    n_tiles = max(1, _cdiv(batch, block_b))
    if n_tiles == 1 and batch >= 1024:
        n_tiles = 2                      # >=2 grid steps so v7x's 2 TensorCores both get work
    tb = min(max_tile, _round_up(_cdiv(batch, n_tiles), 8))   # padding waste < 8 rows/tile
    n_tiles = _cdiv(batch, tb)
    return tb, n_tiles * tb, n_tiles


def net_multi_forward(tokens, params, num_classes, *, block_b=2048):
    """Eval-mode NetMulti forward. tokens: (B, L) int32 -> (B, num_classes) f32."""
    B, L = tokens.shape
    bc_p = params["bc"]
    cpad = bc_p.shape[1]
    tb, b_pad, n_tiles = _batch_tiling(B, block_b)

    if "lut" in params:
        # --- primary path: gather fused in-kernel via one-hot @ folded lookup table ---
        m_p = params["lut"]                                    # (L, Vpad, Cpad) f32
        vpad = m_p.shape[1]
        tok_p = tokens.astype(jnp.int32)
        if b_pad != B:
            tok_p = jnp.pad(tok_p, ((0, b_pad - B), (0, 0)))   # pad index 0 is a valid row
        vmem_need = 2 * tb * 4 * (L + cpad) + 4 * m_p.size + 8 * cpad
        cost = pl.CostEstimate(
            flops=2 * b_pad * L * vpad * cpad, transcendentals=0,
            bytes_accessed=4 * (b_pad * L + m_p.size + cpad + b_pad * cpad))
        out_p = pl.pallas_call(
            _lut_kernel,
            out_shape=jax.ShapeDtypeStruct((b_pad, cpad), jnp.float32),
            grid=(n_tiles,),
            in_specs=[
                pl.BlockSpec((tb, L), lambda i: (i, 0)),             # tokens: only HBM stream in
                pl.BlockSpec((L, vpad, cpad), lambda i: (0, 0, 0)),  # folded LUT, VMEM resident
                pl.BlockSpec((1, cpad), lambda i: (0, 0)),           # folded bias
            ],
            out_specs=pl.BlockSpec((tb, cpad), lambda i: (i, 0)),
            compiler_params=pltpu.CompilerParams(
                dimension_semantics=("parallel",),
                vmem_limit_bytes=_vmem_limit(vmem_need)),
            cost_estimate=cost,
        )(tok_p, m_p, bc_p)
    else:
        # --- fallback path (large vocab): XLA embedding gather + folded matmul kernel ---
        wc_p, emb = params["wc"], params["emb"]
        K = wc_p.shape[0]
        flat = jnp.take(emb, tokens, axis=0).reshape(B, K)     # nn.Embedding + nn.Flatten
        if b_pad != B:
            flat = jnp.pad(flat, ((0, b_pad - B), (0, 0)))
        vmem_need = 2 * tb * 4 * (K + cpad) + 4 * wc_p.size + 8 * cpad
        cost = pl.CostEstimate(
            flops=2 * b_pad * K * cpad, transcendentals=0,
            bytes_accessed=4 * (b_pad * K + wc_p.size + cpad + b_pad * cpad))
        out_p = pl.pallas_call(
            _folded_matmul_kernel,
            out_shape=jax.ShapeDtypeStruct((b_pad, cpad), jnp.float32),
            grid=(n_tiles,),
            in_specs=[
                pl.BlockSpec((tb, K), lambda i: (i, 0)),
                pl.BlockSpec((K, cpad), lambda i: (0, 0)),
                pl.BlockSpec((1, cpad), lambda i: (0, 0)),
            ],
            out_specs=pl.BlockSpec((tb, cpad), lambda i: (i, 0)),
            compiler_params=pltpu.CompilerParams(
                dimension_semantics=("parallel",),
                vmem_limit_bytes=_vmem_limit(vmem_need)),
            cost_estimate=cost,
        )(flat, wc_p, bc_p)

    # Lane-dense (Cpad=128) slab keeps the kernel's stores unmasked; un-pad batch/classes here.
    # TODO(synk): hand the padded slab straight to the consumer when possible to skip this slice.
    return out_p[:B, :num_classes]


# ------------------------------------------------------------------ self-test --------
if __name__ == "__main__":
    embedding_dim = 8
    max_index = 50
    max_string_length = 16
    num_classes = 4
    batch = 2

    key = jax.random.PRNGKey(0)
    k_tok, k_emb, k_w1, k_b1, k_w2, k_b2 = jax.random.split(key, 6)

    tokens = jax.random.randint(k_tok, (batch, max_string_length), 0, max_index, dtype=jnp.int32)
    emb_table = jax.random.normal(k_emb, (max_index, embedding_dim), dtype=jnp.float32) * 0.1
    d_in = embedding_dim * max_string_length
    w1 = jax.random.normal(k_w1, (100, d_in), dtype=jnp.float32) * 0.05
    b1 = jax.random.normal(k_b1, (100,), dtype=jnp.float32) * 0.01
    w2 = jax.random.normal(k_w2, (num_classes, 100), dtype=jnp.float32) * 0.05
    b2 = jax.random.normal(k_b2, (num_classes,), dtype=jnp.float32) * 0.01

    # Pure-JAX f32 reference of the ORIGINAL (unfolded) eval-mode forward semantics.
    flat_ref = jnp.take(emb_table, tokens, axis=0).reshape(batch, d_in)
    h_ref = jnp.dot(flat_ref, w1.T, precision=lax.Precision.HIGHEST) + b1
    ref = jnp.dot(h_ref, w2.T, precision=lax.Precision.HIGHEST) + b2

    fwd = jax.jit(functools.partial(net_multi_forward, num_classes=num_classes))

    # Primary path: embedding folded into a VMEM-resident lookup table, gather fused in-kernel.
    params, n_cls = net_multi_prepare(emb_table, w1, b1, w2, b2)
    assert n_cls == num_classes and "lut" in params
    out = jax.block_until_ready(fwd(tokens, params))
    assert out.shape == (batch, num_classes)
    assert jnp.allclose(out, ref, atol=2e-3, rtol=2e-2)

    # Fallback path (large-vocabulary configuration): XLA gather + folded matmul kernel.
    params_mm, _ = net_multi_prepare(emb_table, w1, b1, w2, b2, lut_budget_bytes=0)
    assert "wc" in params_mm
    out_mm = jax.block_until_ready(fwd(tokens, params_mm))
    assert out_mm.shape == (batch, num_classes)
    assert jnp.allclose(out_mm, ref, atol=2e-3, rtol=2e-2)

    print("KERNEL_OK")
</pallas_src>

<mosaic_0001>
module attributes {stable_mosaic.version = 11 : i64} {
  func.func @_lut_kernel(%arg0: i32, %arg1: memref<8x16xi32, #tpu.memory_space<vmem>>, %arg2: memref<16x128x128xf32, #tpu.memory_space<vmem>>, %arg3: memref<1x128xf32, #tpu.memory_space<vmem>>, %arg4: memref<8x128xf32, #tpu.memory_space<vmem>>) attributes {dimension_semantics = [#tpu.dimension_semantics<parallel>], iteration_bounds = array<i64: 1>, scalar_prefetch = 0 : i64, scratch_operands = 0 : i64, tpu.core_type = #tpu.core_type<tc>, window_params = [{transform_indices = @transform_0, window_bounds = array<i64: 8, 16>}, {pipeline_mode = #tpu.pipeline_mode<synchronous>, transform_indices = @transform_1, window_bounds = array<i64: 16, 128, 128>}, {pipeline_mode = #tpu.pipeline_mode<synchronous>, transform_indices = @transform_2, window_bounds = array<i64: 1, 128>}, {transform_indices = @transform_3, window_bounds = array<i64: 8, 128>}]} {
    %c0 = arith.constant 0 : index
    %c0_0 = arith.constant 0 : index
    %0 = vector.load %arg1[%c0, %c0_0] : memref<8x16xi32, #tpu.memory_space<vmem>>, vector<8x16xi32>
    %1 = tpu.iota {dimensions = array<i32: 1>} : vector<8x128xi32>
    %c0_1 = arith.constant 0 : index
    %c0_2 = arith.constant 0 : index
    %2 = vector.load %arg3[%c0_1, %c0_2] : memref<1x128xf32, #tpu.memory_space<vmem>>, vector<1x128xf32>
    %3 = vector.shape_cast %2 : vector<1x128xf32> to vector<1x128xf32>
    %4 = vector.broadcast %3 : vector<1x128xf32> to vector<8x128xf32>
    %c0_3 = arith.constant 0 : index
    %c0_4 = arith.constant 0 : index
    %5 = vector.load %arg4[%c0_3, %c0_4] : memref<8x128xf32, #tpu.memory_space<vmem>>, vector<8x128xf32>
    tpu.vector_store %arg4[%c0_3, %c0_4], %4 {strides = array<i32>} : memref<8x128xf32, #tpu.memory_space<vmem>>, vector<8x128xf32>,
    %6 = vector.extract_strided_slice %0 {offsets = [0, 0], sizes = [8, 1], strides = [1, 1]} : vector<8x16xi32> to vector<8x1xi32>
    %7 = vector.broadcast %6 : vector<8x1xi32> to vector<8x128xi32>
    %8 = arith.cmpi eq, %1, %7 : vector<8x128xi32>
    %cst = arith.constant 1.000000e+00 : f32
    %cst_5 = arith.constant 0.000000e+00 : f32
    %9 = vector.broadcast %cst : f32 to vector<8x128xf32>
    %10 = vector.broadcast %cst_5 : f32 to vector<8x128xf32>
    %11 = arith.select %8, %9, %10 : vector<8x128xi1>, vector<8x128xf32>
    %c0_6 = arith.constant 0 : index
    %c0_7 = arith.constant 0 : index
    %12 = vector.load %arg4[%c0_6, %c0_7] : memref<8x128xf32, #tpu.memory_space<vmem>>, vector<8x128xf32>
    %c0_8 = arith.constant 0 : index
    %c0_9 = arith.constant 0 : index
    %c0_10 = arith.constant 0 : index
    %13 = vector.load %arg2[%c0_8, %c0_9, %c0_10] : memref<16x128x128xf32, #tpu.memory_space<vmem>>, vector<1x128x128xf32>
    %14 = vector.shape_cast %13 : vector<1x128x128xf32> to vector<128x128xf32>
    %cst_11 = arith.constant dense<0.000000e+00> : vector<8x128xf32>
    %15 = tpu.matmul %11, %14, %cst_11 {dimension_numbers = #tpu.dot_dimension_numbers<[1], [0], [0], [1], [0, 0, 1, 1], [], []>} : vector<8x128xf32>, vector<128x128xf32>, vector<8x128xf32> -> vector<8x128xf32>
    %16 = arith.addf %12, %15 : vector<8x128xf32>
    %c0_12 = arith.constant 0 : index
    %c0_13 = arith.constant 0 : index
    %17 = vector.load %arg4[%c0_12, %c0_13] : memref<8x128xf32, #tpu.memory_space<vmem>>, vector<8x128xf32>
    tpu.vector_store %arg4[%c0_12, %c0_13], %16 {strides = array<i32>} : memref<8x128xf32, #tpu.memory_space<vmem>>, vector<8x128xf32>,
    %18 = vector.extract_strided_slice %0 {offsets = [0, 1], sizes = [8, 1], strides = [1, 1]} : vector<8x16xi32> to vector<8x1xi32>
    %19 = vector.broadcast %18 : vector<8x1xi32> to vector<8x128xi32>
    %20 = arith.cmpi eq, %1, %19 : vector<8x128xi32>
    %cst_14 = arith.constant 1.000000e+00 : f32
    %cst_15 = arith.constant 0.000000e+00 : f32
    %21 = vector.broadcast %cst_14 : f32 to vector<8x128xf32>
    %22 = vector.broadcast %cst_15 : f32 to vector<8x128xf32>
    %23 = arith.select %20, %21, %22 : vector<8x128xi1>, vector<8x128xf32>
    %c0_16 = arith.constant 0 : index
    %c0_17 = arith.constant 0 : index
    %24 = vector.load %arg4[%c0_16, %c0_17] : memref<8x128xf32, #tpu.memory_space<vmem>>, vector<8x128xf32>
    %c1 = arith.constant 1 : index
    %c0_18 = arith.constant 0 : index
    %c0_19 = arith.constant 0 : index
    %25 = vector.load %arg2[%c1, %c0_18, %c0_19] : memref<16x128x128xf32, #tpu.memory_space<vmem>>, vector<1x128x128xf32>
    %26 = vector.shape_cast %25 : vector<1x128x128xf32> to vector<128x128xf32>
    %cst_20 = arith.constant dense<0.000000e+00> : vector<8x128xf32>
    %27 = tpu.matmul %23, %26, %cst_20 {dimension_numbers = #tpu.dot_dimension_numbers<[1], [0], [0], [1], [0, 0, 1, 1], [], []>} : vector<8x128xf32>, vector<128x128xf32>, vector<8x128xf32> -> vector<8x128xf32>
    %28 = arith.addf %24, %27 : vector<8x128xf32>
    %c0_21 = arith.constant 0 : index
    %c0_22 = arith.constant 0 : index
    %29 = vector.load %arg4[%c0_21, %c0_22] : memref<8x128xf32, #tpu.memory_space<vmem>>, vector<8x128xf32>
    tpu.vector_store %arg4[%c0_21, %c0_22], %28 {strides = array<i32>} : memref<8x128xf32, #tpu.memory_space<vmem>>, vector<8x128xf32>,
    %30 = vector.extract_strided_slice %0 {offsets = [0, 2], sizes = [8, 1], strides = [1, 1]} : vector<8x16xi32> to vector<8x1xi32>
    %31 = vector.broadcast %30 : vector<8x1xi32> to vector<8x128xi32>
    %32 = arith.cmpi eq, %1, %31 : vector<8x128xi32>
    %cst_23 = arith.constant 1.000000e+00 : f32
    %cst_24 = arith.constant 0.000000e+00 : f32
    %33 = vector.broadcast %cst_23 : f32 to vector<8x128xf32>
    %34 = vector.broadcast %cst_24 : f32 to vector<8x128xf32>
    %35 = arith.select %32, %33, %34 : vector<8x128xi1>, vector<8x128xf32>
    %c0_25 = arith.constant 0 : index
    %c0_26 = arith.constant 0 : index
    %36 = vector.load %arg4[%c0_25, %c0_26] : memref<8x128xf32, #tpu.memory_space<vmem>>, vector<8x128xf32>
    %c2 = arith.constant 2 : index
    %c0_27 = arith.constant 0 : index
    %c0_28 = arith.constant 0 : index
    %37 = vector.load %arg2[%c2, %c0_27, %c0_28] : memref<16x128x128xf32, #tpu.memory_space<vmem>>, vector<1x128x128xf32>
    %38 = vector.shape_cast %37 : vector<1x128x128xf32> to vector<128x128xf32>
    %cst_29 = arith.constant dense<0.000000e+00> : vector<8x128xf32>
    %39 = tpu.matmul %35, %38, %cst_29 {dimension_numbers = #tpu.dot_dimension_numbers<[1], [0], [0], [1], [0, 0, 1, 1], [], []>} : vector<8x128xf32>, vector<128x128xf32>, vector<8x128xf32> -> vector<8x128xf32>
    %40 = arith.addf %36, %39 : vector<8x128xf32>
    %c0_30 = arith.constant 0 : index
    %c0_31 = arith.constant 0 : index
    %41 = vector.load %arg4[%c0_30, %c0_31] : memref<8x128xf32, #tpu.memory_space<vmem>>, vector<8x128xf32>
    tpu.vector_store %arg4[%c0_30, %c0_31], %40 {strides = array<i32>} : memref<8x128xf32, #tpu.memory_space<vmem>>, vector<8x128xf32>,
    %42 = vector.extract_strided_slice %0 {offsets = [0, 3], sizes = [8, 1], strides = [1, 1]} : vector<8x16xi32> to vector<8x1xi32>
    %43 = vector.broadcast %42 : vector<8x1xi32> to vector<8x128xi32>
    %44 = arith.cmpi eq, %1, %43 : vector<8x128xi32>
    %cst_32 = arith.constant 1.000000e+00 : f32
    %cst_33 = arith.constant 0.000000e+00 : f32
    %45 = vector.broadcast %cst_32 : f32 to vector<8x128xf32>
    %46 = vector.broadcast %cst_33 : f32 to vector<8x128xf32>
    %47 = arith.select %44, %45, %46 : vector<8x128xi1>, vector<8x128xf32>
    %c0_34 = arith.constant 0 : index
    %c0_35 = arith.constant 0 : index
    %48 = vector.load %arg4[%c0_34, %c0_35] : memref<8x128xf32, #tpu.memory_space<vmem>>, vector<8x128xf32>
    %c3 = arith.constant 3 : index
    %c0_36 = arith.constant 0 : index
    %c0_37 = arith.constant 0 : index
    %49 = vector.load %arg2[%c3, %c0_36, %c0_37] : memref<16x128x128xf32, #tpu.memory_space<vmem>>, vector<1x128x128xf32>
    %50 = vector.shape_cast %49 : vector<1x128x128xf32> to vector<128x128xf32>
    %cst_38 = arith.constant dense<0.000000e+00> : vector<8x128xf32>
    %51 = tpu.matmul %47, %50, %cst_38 {dimension_numbers = #tpu.dot_dimension_numbers<[1], [0], [0], [1], [0, 0, 1, 1], [], []>} : vector<8x128xf32>, vector<128x128xf32>, vector<8x128xf32> -> vector<8x128xf32>
    %52 = arith.addf %48, %51 : vector<8x128xf32>
    %c0_39 = arith.constant 0 : index
    %c0_40 = arith.constant 0 : index
    %53 = vector.load %arg4[%c0_39, %c0_40] : memref<8x128xf32, #tpu.memory_space<vmem>>, vector<8x128xf32>
    tpu.vector_store %arg4[%c0_39, %c0_40], %52 {strides = array<i32>} : memref<8x128xf32, #tpu.memory_space<vmem>>, vector<8x128xf32>,
    %54 = vector.extract_strided_slice %0 {offsets = [0, 4], sizes = [8, 1], strides = [1, 1]} : vector<8x16xi32> to vector<8x1xi32>
    %55 = vector.broadcast %54 : vector<8x1xi32> to vector<8x128xi32>
    %56 = arith.cmpi eq, %1, %55 : vector<8x128xi32>
    %cst_41 = arith.constant 1.000000e+00 : f32
    %cst_42 = arith.constant 0.000000e+00 : f32
    %57 = vector.broadcast %cst_41 : f32 to vector<8x128xf32>
    %58 = vector.broadcast %cst_42 : f32 to vector<8x128xf32>
    %59 = arith.select %56, %57, %58 : vector<8x128xi1>, vector<8x128xf32>
    %c0_43 = arith.constant 0 : index
    %c0_44 = arith.constant 0 : index
    %60 = vector.load %arg4[%c0_43, %c0_44] : memref<8x128xf32, #tpu.memory_space<vmem>>, vector<8x128xf32>
    %c4 = arith.constant 4 : index
    %c0_45 = arith.constant 0 : index
    %c0_46 = arith.constant 0 : index
    %61 = vector.load %arg2[%c4, %c0_45, %c0_46] : memref<16x128x128xf32, #tpu.memory_space<vmem>>, vector<1x128x128xf32>
    %62 = vector.shape_cast %61 : vector<1x128x128xf32> to vector<128x128xf32>
    %cst_47 = arith.constant dense<0.000000e+00> : vector<8x128xf32>
    %63 = tpu.matmul %59, %62, %cst_47 {dimension_numbers = #tpu.dot_dimension_numbers<[1], [0], [0], [1], [0, 0, 1, 1], [], []>} : vector<8x128xf32>, vector<128x128xf32>, vector<8x128xf32> -> vector<8x128xf32>
    %64 = arith.addf %60, %63 : vector<8x128xf32>
    %c0_48 = arith.constant 0 : index
    %c0_49 = arith.constant 0 : index
    %65 = vector.load %arg4[%c0_48, %c0_49] : memref<8x128xf32, #tpu.memory_space<vmem>>, vector<8x128xf32>
    tpu.vector_store %arg4[%c0_48, %c0_49], %64 {strides = array<i32>} : memref<8x128xf32, #tpu.memory_space<vmem>>, vector<8x128xf32>,
    %66 = vector.extract_strided_slice %0 {offsets = [0, 5], sizes = [8, 1], strides = [1, 1]} : vector<8x16xi32> to vector<8x1xi32>
    %67 = vector.broadcast %66 : vector<8x1xi32> to vector<8x128xi32>
    %68 = arith.cmpi eq, %1, %67 : vector<8x128xi32>
    %cst_50 = arith.constant 1.000000e+00 : f32
    %cst_51 = arith.constant 0.000000e+00 : f32
    %69 = vector.broadcast %cst_50 : f32 to vector<8x128xf32>
    %70 = vector.broadcast %cst_51 : f32 to vector<8x128xf32>
    %71 = arith.select %68, %69, %70 : vector<8x128xi1>, vector<8x128xf32>
    %c0_52 = arith.constant 0 : index
    %c0_53 = arith.constant 0 : index
    %72 = vector.load %arg4[%c0_52, %c0_53] : memref<8x128xf32, #tpu.memory_space<vmem>>, vector<8x128xf32>
    %c5 = arith.constant 5 : index
    %c0_54 = arith.constant 0 : index
    %c0_55 = arith.constant 0 : index
    %73 = vector.load %arg2[%c5, %c0_54, %c0_55] : memref<16x128x128xf32, #tpu.memory_space<vmem>>, vector<1x128x128xf32>
    %74 = vector.shape_cast %73 : vector<1x128x128xf32> to vector<128x128xf32>
    %cst_56 = arith.constant dense<0.000000e+00> : vector<8x128xf32>
    %75 = tpu.matmul %71, %74, %cst_56 {dimension_numbers = #tpu.dot_dimension_numbers<[1], [0], [0], [1], [0, 0, 1, 1], [], []>} : vector<8x128xf32>, vector<128x128xf32>, vector<8x128xf32> -> vector<8x128xf32>
    %76 = arith.addf %72, %75 : vector<8x128xf32>
    %c0_57 = arith.constant 0 : index
    %c0_58 = arith.constant 0 : index
    %77 = vector.load %arg4[%c0_57, %c0_58] : memref<8x128xf32, #tpu.memory_space<vmem>>, vector<8x128xf32>
    tpu.vector_store %arg4[%c0_57, %c0_58], %76 {strides = array<i32>} : memref<8x128xf32, #tpu.memory_space<vmem>>, vector<8x128xf32>,
    %78 = vector.extract_strided_slice %0 {offsets = [0, 6], sizes = [8, 1], strides = [1, 1]} : vector<8x16xi32> to vector<8x1xi32>
    %79 = vector.broadcast %78 : vector<8x1xi32> to vector<8x128xi32>
    %80 = arith.cmpi eq, %1, %79 : vector<8x128xi32>
    %cst_59 = arith.constant 1.000000e+00 : f32
    %cst_60 = arith.constant 0.000000e+00 : f32
    %81 = vector.broadcast %cst_59 : f32 to vector<8x128xf32>
    %82 = vector.broadcast %cst_60 : f32 to vector<8x128xf32>
    %83 = arith.select %80, %81, %82 : vector<8x128xi1>, vector<8x128xf32>
    %c0_61 = arith.constant 0 : index
    %c0_62 = arith.constant 0 : index
    %84 = vector.load %arg4[%c0_61, %c0_62] : memref<8x128xf32, #tpu.memory_space<vmem>>, vector<8x128xf32>
    %c6 = arith.constant 6 : index
    %c0_63 = arith.constant 0 : index
    %c0_64 = arith.constant 0 : index
    %85 = vector.load %arg2[%c6, %c0_63, %c0_64] : memref<16x128x128xf32, #tpu.memory_space<vmem>>, vector<1x128x128xf32>
    %86 = vector.shape_cast %85 : vector<1x128x128xf32> to vector<128x128xf32>
    %cst_65 = arith.constant dense<0.000000e+00> : vector<8x128xf32>
    %87 = tpu.matmul %83, %86, %cst_65 {dimension_numbers = #tpu.dot_dimension_numbers<[1], [0], [0], [1], [0, 0, 1, 1], [], []>} : vector<8x128xf32>, vector<128x128xf32>, vector<8x128xf32> -> vector<8x128xf32>
    %88 = arith.addf %84, %87 : vector<8x128xf32>
    %c0_66 = arith.constant 0 : index
    %c0_67 = arith.constant 0 : index
    %89 = vector.load %arg4[%c0_66, %c0_67] : memref<8x128xf32, #tpu.memory_space<vmem>>, vector<8x128xf32>
    tpu.vector_store %arg4[%c0_66, %c0_67], %88 {strides = array<i32>} : memref<8x128xf32, #tpu.memory_space<vmem>>, vector<8x128xf32>,
    %90 = vector.extract_strided_slice %0 {offsets = [0, 7], sizes = [8, 1], strides = [1, 1]} : vector<8x16xi32> to vector<8x1xi32>
    %91 = vector.broadcast %90 : vector<8x1xi32> to vector<8x128xi32>
    %92 = arith.cmpi eq, %1, %91 : vector<8x128xi32>
    %cst_68 = arith.constant 1.000000e+00 : f32
    %cst_69 = arith.constant 0.000000e+00 : f32
    %93 = vector.broadcast %cst_68 : f32 to vector<8x128xf32>
    %94 = vector.broadcast %cst_69 : f32 to vector<8x128xf32>
    %95 = arith.select %92, %93, %94 : vector<8x128xi1>, vector<8x128xf32>
    %c0_70 = arith.constant 0 : index
    %c0_71 = arith.constant 0 : index
    %96 = vector.load %arg4[%c0_70, %c0_71] : memref<8x128xf32, #tpu.memory_space<vmem>>, vector<8x128xf32>
    %c7 = arith.constant 7 : index
    %c0_72 = arith.constant 0 : index
    %c0_73 = arith.constant 0 : index
    %97 = vector.load %arg2[%c7, %c0_72, %c0_73] : memref<16x128x128xf32, #tpu.memory_space<vmem>>, vector<1x128x128xf32>
    %98 = vector.shape_cast %97 : vector<1x128x128xf32> to vector<128x128xf32>
    %cst_74 = arith.constant dense<0.000000e+00> : vector<8x128xf32>
    %99 = tpu.matmul %95, %98, %cst_74 {dimension_numbers = #tpu.dot_dimension_numbers<[1], [0], [0], [1], [0, 0, 1, 1], [], []>} : vector<8x128xf32>, vector<128x128xf32>, vector<8x128xf32> -> vector<8x128xf32>
    %100 = arith.addf %96, %99 : vector<8x128xf32>
    %c0_75 = arith.constant 0 : index
    %c0_76 = arith.constant 0 : index
    %101 = vector.load %arg4[%c0_75, %c0_76] : memref<8x128xf32, #tpu.memory_space<vmem>>, vector<8x128xf32>
    tpu.vector_store %arg4[%c0_75, %c0_76], %100 {strides = array<i32>} : memref<8x128xf32, #tpu.memory_space<vmem>>, vector<8x128xf32>,
    %102 = vector.extract_strided_slice %0 {offsets = [0, 8], sizes = [8, 1], strides = [1, 1]} : vector<8x16xi32> to vector<8x1xi32>
    %103 = vector.broadcast %102 : vector<8x1xi32> to vector<8x128xi32>
    %104 = arith.cmpi eq, %1, %103 : vector<8x128xi32>
    %cst_77 = arith.constant 1.000000e+00 : f32
    %cst_78 = arith.constant 0.000000e+00 : f32
    %105 = vector.broadcast %cst_77 : f32 to vector<8x128xf32>
    %106 = vector.broadcast %cst_78 : f32 to vector<8x128xf32>
    %107 = arith.select %104, %105, %106 : vector<8x128xi1>, vector<8x128xf32>
    %c0_79 = arith.constant 0 : index
    %c0_80 = arith.constant 0 : index
    %108 = vector.load %arg4[%c0_79, %c0_80] : memref<8x128xf32, #tpu.memory_space<vmem>>, vector<8x128xf32>
    %c8 = arith.constant 8 : index
    %c0_81 = arith.constant 0 : index
    %c0_82 = arith.constant 0 : index
    %109 = vector.load %arg2[%c8, %c0_81, %c0_82] : memref<16x128x128xf32, #tpu.memory_space<vmem>>, vector<1x128x128xf32>
    %110 = vector.shape_cast %109 : vector<1x128x128xf32> to vector<128x128xf32>
    %cst_83 = arith.constant dense<0.000000e+00> : vector<8x128xf32>
    %111 = tpu.matmul %107, %110, %cst_83 {dimension_numbers = #tpu.dot_dimension_numbers<[1], [0], [0], [1], [0, 0, 1, 1], [], []>} : vector<8x128xf32>, vector<128x128xf32>, vector<8x128xf32> -> vector<8x128xf32>
    %112 = arith.addf %108, %111 : vector<8x128xf32>
    %c0_84 = arith.constant 0 : index
    %c0_85 = arith.constant 0 : index
    %113 = vector.load %arg4[%c0_84, %c0_85] : memref<8x128xf32, #tpu.memory_space<vmem>>, vector<8x128xf32>
    tpu.vector_store %arg4[%c0_84, %c0_85], %112 {strides = array<i32>} : memref<8x128xf32, #tpu.memory_space<vmem>>, vector<8x128xf32>,
    %114 = vector.extract_strided_slice %0 {offsets = [0, 9], sizes = [8, 1], strides = [1, 1]} : vector<8x16xi32> to vector<8x1xi32>
    %115 = vector.broadcast %114 : vector<8x1xi32> to vector<8x128xi32>
    %116 = arith.cmpi eq, %1, %115 : vector<8x128xi32>
    %cst_86 = arith.constant 1.000000e+00 : f32
    %cst_87 = arith.constant 0.000000e+00 : f32
    %117 = vector.broadcast %cst_86 : f32 to vector<8x128xf32>
    %118 = vector.broadcast %cst_87 : f32 to vector<8x128xf32>
    %119 = arith.select %116, %117, %118 : vector<8x128xi1>, vector<8x128xf32>
    %c0_88 = arith.constant 0 : index
    %c0_89 = arith.constant 0 : index
    %120 = vector.load %arg4[%c0_88, %c0_89] : memref<8x128xf32, #tpu.memory_space<vmem>>, vector<8x128xf32>
    %c9 = arith.constant 9 : index
    %c0_90 = arith.constant 0 : index
    %c0_91 = arith.constant 0 : index
    %121 = vector.load %arg2[%c9, %c0_90, %c0_91] : memref<16x128x128xf32, #tpu.memory_space<vmem>>, vector<1x128x128xf32>
    %122 = vector.shape_cast %121 : vector<1x128x128xf32> to vector<128x128xf32>
    %cst_92 = arith.constant dense<0.000000e+00> : vector<8x128xf32>
    %123 = tpu.matmul %119, %122, %cst_92 {dimension_numbers = #tpu.dot_dimension_numbers<[1], [0], [0], [1], [0, 0, 1, 1], [], []>} : vector<8x128xf32>, vector<128x128xf32>, vector<8x128xf32> -> vector<8x128xf32>
    %124 = arith.addf %120, %123 : vector<8x128xf32>
    %c0_93 = arith.constant 0 : index
    %c0_94 = arith.constant 0 : index
    %125 = vector.load %arg4[%c0_93, %c0_94] : memref<8x128xf32, #tpu.memory_space<vmem>>, vector<8x128xf32>
    tpu.vector_store %arg4[%c0_93, %c0_94], %124 {strides = array<i32>} : memref<8x128xf32, #tpu.memory_space<vmem>>, vector<8x128xf32>,
    %126 = vector.extract_strided_slice %0 {offsets = [0, 10], sizes = [8, 1], strides = [1, 1]} : vector<8x16xi32> to vector<8x1xi32>
    %127 = vector.broadcast %126 : vector<8x1xi32> to vector<8x128xi32>
    %128 = arith.cmpi eq, %1, %127 : vector<8x128xi32>
    %cst_95 = arith.constant 1.000000e+00 : f32
    %cst_96 = arith.constant 0.000000e+00 : f32
    %129 = vector.broadcast %cst_95 : f32 to vector<8x128xf32>
    %130 = vector.broadcast %cst_96 : f32 to vector<8x128xf32>
    %131 = arith.select %128, %129, %130 : vector<8x128xi1>, vector<8x128xf32>
    %c0_97 = arith.constant 0 : index
    %c0_98 = arith.constant 0 : index
    %132 = vector.load %arg4[%c0_97, %c0_98] : memref<8x128xf32, #tpu.memory_space<vmem>>, vector<8x128xf32>
    %c10 = arith.constant 10 : index
    %c0_99 = arith.constant 0 : index
    %c0_100 = arith.constant 0 : index
    %133 = vector.load %arg2[%c10, %c0_99, %c0_100] : memref<16x128x128xf32, #tpu.memory_space<vmem>>, vector<1x128x128xf32>
    %134 = vector.shape_cast %133 : vector<1x128x128xf32> to vector<128x128xf32>
    %cst_101 = arith.constant dense<0.000000e+00> : vector<8x128xf32>
    %135 = tpu.matmul %131, %134, %cst_101 {dimension_numbers = #tpu.dot_dimension_numbers<[1], [0], [0], [1], [0, 0, 1, 1], [], []>} : vector<8x128xf32>, vector<128x128xf32>, vector<8x128xf32> -> vector<8x128xf32>
    %136 = arith.addf %132, %135 : vector<8x128xf32>
    %c0_102 = arith.constant 0 : index
    %c0_103 = arith.constant 0 : index
    %137 = vector.load %arg4[%c0_102, %c0_103] : memref<8x128xf32, #tpu.memory_space<vmem>>, vector<8x128xf32>
    tpu.vector_store %arg4[%c0_102, %c0_103], %136 {strides = array<i32>} : memref<8x128xf32, #tpu.memory_space<vmem>>, vector<8x128xf32>,
    %138 = vector.extract_strided_slice %0 {offsets = [0, 11], sizes = [8, 1], strides = [1, 1]} : vector<8x16xi32> to vector<8x1xi32>
    %139 = vector.broadcast %138 : vector<8x1xi32> to vector<8x128xi32>
    %140 = arith.cmpi eq, %1, %139 : vector<8x128xi32>
    %cst_104 = arith.constant 1.000000e+00 : f32
    %cst_105 = arith.constant 0.000000e+00 : f32
    %141 = vector.broadcast %cst_104 : f32 to vector<8x128xf32>
    %142 = vector.broadcast %cst_105 : f32 to vector<8x128xf32>
    %143 = arith.select %140, %141, %142 : vector<8x128xi1>, vector<8x128xf32>
    %c0_106 = arith.constant 0 : index
    %c0_107 = arith.constant 0 : index
    %144 = vector.load %arg4[%c0_106, %c0_107] : memref<8x128xf32, #tpu.memory_space<vmem>>, vector<8x128xf32>
    %c11 = arith.constant 11 : index
    %c0_108 = arith.constant 0 : index
    %c0_109 = arith.constant 0 : index
    %145 = vector.load %arg2[%c11, %c0_108, %c0_109] : memref<16x128x128xf32, #tpu.memory_space<vmem>>, vector<1x128x128xf32>
    %146 = vector.shape_cast %145 : vector<1x128x128xf32> to vector<128x128xf32>
    %cst_110 = arith.constant dense<0.000000e+00> : vector<8x128xf32>
    %147 = tpu.matmul %143, %146, %cst_110 {dimension_numbers = #tpu.dot_dimension_numbers<[1], [0], [0], [1], [0, 0, 1, 1], [], []>} : vector<8x128xf32>, vector<128x128xf32>, vector<8x128xf32> -> vector<8x128xf32>
    %148 = arith.addf %144, %147 : vector<8x128xf32>
    %c0_111 = arith.constant 0 : index
    %c0_112 = arith.constant 0 : index
    %149 = vector.load %arg4[%c0_111, %c0_112] : memref<8x128xf32, #tpu.memory_space<vmem>>, vector<8x128xf32>
    tpu.vector_store %arg4[%c0_111, %c0_112], %148 {strides = array<i32>} : memref<8x128xf32, #tpu.memory_space<vmem>>, vector<8x128xf32>,
    %150 = vector.extract_strided_slice %0 {offsets = [0, 12], sizes = [8, 1], strides = [1, 1]} : vector<8x16xi32> to vector<8x1xi32>
    %151 = vector.broadcast %150 : vector<8x1xi32> to vector<8x128xi32>
    %152 = arith.cmpi eq, %1, %151 : vector<8x128xi32>
    %cst_113 = arith.constant 1.000000e+00 : f32
    %cst_114 = arith.constant 0.000000e+00 : f32
    %153 = vector.broadcast %cst_113 : f32 to vector<8x128xf32>
    %154 = vector.broadcast %cst_114 : f32 to vector<8x128xf32>
    %155 = arith.select %152, %153, %154 : vector<8x128xi1>, vector<8x128xf32>
    %c0_115 = arith.constant 0 : index
    %c0_116 = arith.constant 0 : index
    %156 = vector.load %arg4[%c0_115, %c0_116] : memref<8x128xf32, #tpu.memory_space<vmem>>, vector<8x128xf32>
    %c12 = arith.constant 12 : index
    %c0_117 = arith.constant 0 : index
    %c0_118 = arith.constant 0 : index
    %157 = vector.load %arg2[%c12, %c0_117, %c0_118] : memref<16x128x128xf32, #tpu.memory_space<vmem>>, vector<1x128x128xf32>
    %158 = vector.shape_cast %157 : vector<1x128x128xf32> to vector<128x128xf32>
    %cst_119 = arith.constant dense<0.000000e+00> : vector<8x128xf32>
    %159 = tpu.matmul %155, %158, %cst_119 {dimension_numbers = #tpu.dot_dimension_numbers<[1], [0], [0], [1], [0, 0, 1, 1], [], []>} : vector<8x128xf32>, vector<128x128xf32>, vector<8x128xf32> -> vector<8x128xf32>
    %160 = arith.addf %156, %159 : vector<8x128xf32>
    %c0_120 = arith.constant 0 : index
    %c0_121 = arith.constant 0 : index
    %161 = vector.load %arg4[%c0_120, %c0_121] : memref<8x128xf32, #tpu.memory_space<vmem>>, vector<8x128xf32>
    tpu.vector_store %arg4[%c0_120, %c0_121], %160 {strides = array<i32>} : memref<8x128xf32, #tpu.memory_space<vmem>>, vector<8x128xf32>,
    %162 = vector.extract_strided_slice %0 {offsets = [0, 13], sizes = [8, 1], strides = [1, 1]} : vector<8x16xi32> to vector<8x1xi32>
    %163 = vector.broadcast %162 : vector<8x1xi32> to vector<8x128xi32>
    %164 = arith.cmpi eq, %1, %163 : vector<8x128xi32>
    %cst_122 = arith.constant 1.000000e+00 : f32
    %cst_123 = arith.constant 0.000000e+00 : f32
    %165 = vector.broadcast %cst_122 : f32 to vector<8x128xf32>
    %166 = vector.broadcast %cst_123 : f32 to vector<8x128xf32>
    %167 = arith.select %164, %165, %166 : vector<8x128xi1>, vector<8x128xf32>
    %c0_124 = arith.constant 0 : index
    %c0_125 = arith.constant 0 : index
    %168 = vector.load %arg4[%c0_124, %c0_125] : memref<8x128xf32, #tpu.memory_space<vmem>>, vector<8x128xf32>
    %c13 = arith.constant 13 : index
    %c0_126 = arith.constant 0 : index
    %c0_127 = arith.constant 0 : index
    %169 = vector.load %arg2[%c13, %c0_126, %c0_127] : memref<16x128x128xf32, #tpu.memory_space<vmem>>, vector<1x128x128xf32>
    %170 = vector.shape_cast %169 : vector<1x128x128xf32> to vector<128x128xf32>
    %cst_128 = arith.constant dense<0.000000e+00> : vector<8x128xf32>
    %171 = tpu.matmul %167, %170, %cst_128 {dimension_numbers = #tpu.dot_dimension_numbers<[1], [0], [0], [1], [0, 0, 1, 1], [], []>} : vector<8x128xf32>, vector<128x128xf32>, vector<8x128xf32> -> vector<8x128xf32>
    %172 = arith.addf %168, %171 : vector<8x128xf32>
    %c0_129 = arith.constant 0 : index
    %c0_130 = arith.constant 0 : index
    %173 = vector.load %arg4[%c0_129, %c0_130] : memref<8x128xf32, #tpu.memory_space<vmem>>, vector<8x128xf32>
    tpu.vector_store %arg4[%c0_129, %c0_130], %172 {strides = array<i32>} : memref<8x128xf32, #tpu.memory_space<vmem>>, vector<8x128xf32>,
    %174 = vector.extract_strided_slice %0 {offsets = [0, 14], sizes = [8, 1], strides = [1, 1]} : vector<8x16xi32> to vector<8x1xi32>
    %175 = vector.broadcast %174 : vector<8x1xi32> to vector<8x128xi32>
    %176 = arith.cmpi eq, %1, %175 : vector<8x128xi32>
    %cst_131 = arith.constant 1.000000e+00 : f32
    %cst_132 = arith.constant 0.000000e+00 : f32
    %177 = vector.broadcast %cst_131 : f32 to vector<8x128xf32>
    %178 = vector.broadcast %cst_132 : f32 to vector<8x128xf32>
    %179 = arith.select %176, %177, %178 : vector<8x128xi1>, vector<8x128xf32>
    %c0_133 = arith.constant 0 : index
    %c0_134 = arith.constant 0 : index
    %180 = vector.load %arg4[%c0_133, %c0_134] : memref<8x128xf32, #tpu.memory_space<vmem>>, vector<8x128xf32>
    %c14 = arith.constant 14 : index
    %c0_135 = arith.constant 0 : index
    %c0_136 = arith.constant 0 : index
    %181 = vector.load %arg2[%c14, %c0_135, %c0_136] : memref<16x128x128xf32, #tpu.memory_space<vmem>>, vector<1x128x128xf32>
    %182 = vector.shape_cast %181 : vector<1x128x128xf32> to vector<128x128xf32>
    %cst_137 = arith.constant dense<0.000000e+00> : vector<8x128xf32>
    %183 = tpu.matmul %179, %182, %cst_137 {dimension_numbers = #tpu.dot_dimension_numbers<[1], [0], [0], [1], [0, 0, 1, 1], [], []>} : vector<8x128xf32>, vector<128x128xf32>, vector<8x128xf32> -> vector<8x128xf32>
    %184 = arith.addf %180, %183 : vector<8x128xf32>
    %c0_138 = arith.constant 0 : index
    %c0_139 = arith.constant 0 : index
    %185 = vector.load %arg4[%c0_138, %c0_139] : memref<8x128xf32, #tpu.memory_space<vmem>>, vector<8x128xf32>
    tpu.vector_store %arg4[%c0_138, %c0_139], %184 {strides = array<i32>} : memref<8x128xf32, #tpu.memory_space<vmem>>, vector<8x128xf32>,
    %186 = vector.extract_strided_slice %0 {offsets = [0, 15], sizes = [8, 1], strides = [1, 1]} : vector<8x16xi32> to vector<8x1xi32>
    %187 = vector.broadcast %186 : vector<8x1xi32> to vector<8x128xi32>
    %188 = arith.cmpi eq, %1, %187 : vector<8x128xi32>
    %cst_140 = arith.constant 1.000000e+00 : f32
    %cst_141 = arith.constant 0.000000e+00 : f32
    %189 = vector.broadcast %cst_140 : f32 to vector<8x128xf32>
    %190 = vector.broadcast %cst_141 : f32 to vector<8x128xf32>
    %191 = arith.select %188, %189, %190 : vector<8x128xi1>, vector<8x128xf32>
    %c0_142 = arith.constant 0 : index
    %c0_143 = arith.constant 0 : index
    %192 = vector.load %arg4[%c0_142, %c0_143] : memref<8x128xf32, #tpu.memory_space<vmem>>, vector<8x128xf32>
    %c15 = arith.constant 15 : index
    %c0_144 = arith.constant 0 : index
    %c0_145 = arith.constant 0 : index
    %193 = vector.load %arg2[%c15, %c0_144, %c0_145] : memref<16x128x128xf32, #tpu.memory_space<vmem>>, vector<1x128x128xf32>
    %194 = vector.shape_cast %193 : vector<1x128x128xf32> to vector<128x128xf32>
    %cst_146 = arith.constant dense<0.000000e+00> : vector<8x128xf32>
    %195 = tpu.matmul %191, %194, %cst_146 {dimension_numbers = #tpu.dot_dimension_numbers<[1], [0], [0], [1], [0, 0, 1, 1], [], []>} : vector<8x128xf32>, vector<128x128xf32>, vector<8x128xf32> -> vector<8x128xf32>
    %196 = arith.addf %192, %195 : vector<8x128xf32>
    %c0_147 = arith.constant 0 : index
    %c0_148 = arith.constant 0 : index
    %197 = vector.load %arg4[%c0_147, %c0_148] : memref<8x128xf32, #tpu.memory_space<vmem>>, vector<8x128xf32>
    tpu.vector_store %arg4[%c0_147, %c0_148], %196 {strides = array<i32>} : memref<8x128xf32, #tpu.memory_space<vmem>>, vector<8x128xf32>,
    return
  }
  func.func @transform_0(%arg0: i32) -> (i32, i32) {
    %c0_i32 = arith.constant 0 : i32
    %c0_i32_0 = arith.constant 0 : i32
    return %arg0, %c0_i32 : i32, i32
  }
  func.func @transform_1(%arg0: i32) -> (i32, i32, i32) {
    %c0_i32 = arith.constant 0 : i32
    %c0_i32_0 = arith.constant 0 : i32
    %c0_i32_1 = arith.constant 0 : i32
    %c0_i32_2 = arith.constant 0 : i32
    return %c0_i32, %c0_i32_0, %c0_i32_1 : i32, i32, i32
  }
  func.func @transform_2(%arg0: i32) -> (i32, i32) {
    %c0_i32 = arith.constant 0 : i32
    %c0_i32_0 = arith.constant 0 : i32
    %c0_i32_1 = arith.constant 0 : i32
    return %c0_i32, %c0_i32_0 : i32, i32
  }
  func.func @transform_3(%arg0: i32) -> (i32, i32) {
    %c0_i32 = arith.constant 0 : i32
    %c0_i32_0 = arith.constant 0 : i32
    return %arg0, %c0_i32 : i32, i32
  }
}

</mosaic_0001>

<bundles_post_ra>
// kernel: net_multi_forward.1
= control target key start
LH: loop header
LB: loop body
LE: loop exit
PB: predicated region body
PF: predicated region fallthrough
CT: control target
= control target key end

     0   :  { %8 = vsyncpa [#allocation3], 0  ;;  %s2894_s12 = smov [#allocation2]   ;;  %s3170_s0 = inlined_call_operand.vmem [shape: s32[8,16], index: 0, kind: input, shape index: {}]   ;;  %s3171_s1 = inlined_call_operand.hbm [shape: f32[16,128,128], index: 1, kind: input, shape index: {}]   ;;  %s3172_s2 = inlined_call_operand.vmem [shape: f32[1,128], index: 2, kind: input, shape index: {}]   ;;  %s3173_s3 = inlined_call_operand.vmem [shape: f32[8,128], index: 3, kind: output, shape index: {}]  }
   0x1   :  { %s16_s13 = sshll.u32 %s2894_s12, 4  ;;  %s2870_s16 = scalar_lea.hbm %s3171_s1, 32768  ;;  %s17_s13 = int_to_ptr.vmem [resolvable:$true] %s16_s13 }
   0x2   :  { %p2871_p0 = scmp.ne.s32.totalorder %s3171_s1, %s2870_s16  ;;  %p2874_p1 = scmp.lt.u32.totalorder %s2870_s16, %s3171_s1 }
   0x4   :  { %p2876_p2 = pnand %p2874_p1, %p2871_p0 }
   0x6   :  { %2879 = shalt.err (!%p2876_p2)
}
   0x7   :  { %s2880_s21 = scalar_lea.vmem %s17_s13, 32768  ;;  %p2885_p4 = scmp.lt.s32.totalorder %s17_s13, %s17_s13 }
   0x8   :  { %p2881_p3 = scmp.ne.s32.totalorder %s17_s13, %s2880_s21  ;;  %p2886_p5 = scmp.lt.s32.totalorder %s2880_s21, %s2880_s21 }
   0xa   :  { %p2887_p6 = por %p2886_p5, %p2885_p4 }
   0xc   :  { %p2888_p7 = pnand %p2887_p6, %p2881_p3 }
   0xe   :  { %2891 = shalt.err (!%p2888_p7)
}
   0xf   :  { %s2895_s22 = smov 128   ;;  %s2896_s23 = smov 8  }
  0x10   :  { %22 = dma.hbm_to_vmem [thread:$0]  %s3171_s1, 32768, %s17_s13, [#allocation3], %s2895_s22, %s2895_s22, %s2896_s23  }
  0x11   :  { %2892 = dma.done.wait [#allocation3], 32768  }
  0x12   :  { %2893 = vsyncadd [#allocation3], 4294934528  ;;  %v2897_v0 = vmov 0   ;;  %v2898_v1 = vmov 1   ;;  %v2899_v2 = vmov 0.0|0.0   ;;  %v2954_v3 = vld [vmem:[%s3170_s0] sm:$0xff] }
  0x13   :  { %2853 = vset.pattern.permute.xlu0 %v2897_v0  ;;  %2855 = vset.pattern.permute.xlu1 %v2898_v1  ;;  %v45_v4 = vld [vmem:[#allocation2] sm:$0xff]  ;;  %v46_v5 = vld [vmem:[#allocation2 + $0x8] sm:$0xff]  ;;  %v47_v7 = vld [vmem:[#allocation2 + $0x10] sm:$0xff]  ;;  %vm2900_vm0 = vmmov 0   ;;  %v2901_v11 = vmov 0.0   ;;  %v2902_v15 = vmov 8  }
  0x14   :  { %2412 = vmatprep.subr.bf16.mxu1 %v2899_v2  ;;  %2604 = vmatprep.subr.bf16.mxu0 %v2899_v2  ;;  %v2413_v6 = vpack.c.bf16 %v46_v5, %v45_v4  ;;  %v48_v8 = vld [vmem:[#allocation2 + $0x18] sm:$0xff]  ;;  %v805_v9 = vld [vmem:[#allocation2 + $0x400] sm:$0xff]  ;;  %v806_v10 = vld [vmem:[#allocation2 + $0x408] sm:$0xff]  ;;  %v2903_v16 = vmov 9   ;;  %v2904_v24 = vmov 2   ;;  %v2905_v25 = vmov 10  }
  0x15   :  { %40 = vperm.xlu0 %2853, %v2954_v3   ;;  %134 = vperm.xlu1 %2855, %v2954_v3   ;;  %v2416_v12 = vpack.c.bf16 %v48_v8, %v47_v7  ;;  %v2605_v13 = vpack.c.bf16 %v806_v10, %v805_v9  ;;  %v49_v14 = vld [vmem:[#allocation2 + $0x20] sm:$0xff]  ;;  %v50_v17 = vld [vmem:[#allocation2 + $0x28] sm:$0xff]  ;;  %v807_v18 = vld [vmem:[#allocation2 + $0x410] sm:$0xff]  ;;  %v2906_v34 = vmov 3   ;;  %v2907_v35 = vmov 4  }
  0x16   :  { %1884 = vmatprep.mubr.msk.f32.mxu1 %vm2900_vm0, %v2901_v11  ;;  %2164 = vmatprep.mubr.msk.f32.mxu0 %vm2900_vm0, %v2901_v11  ;;  %v808_v19 = vld [vmem:[#allocation2 + $0x418] sm:$0xff]  ;;  %v2419_v20 = vpack.c.bf16 %v50_v17, %v49_v14  ;;  %v51_v22 = vld [vmem:[#allocation2 + $0x30] sm:$0xff]  ;;  %v809_v26 = vld [vmem:[#allocation2 + $0x420] sm:$0xff]  ;;  %v2908_v42 = vmov 11   ;;  %v2909_v55 = vmov 12   ;;  %v2910_v61 = vmov 5  }
  0x17   :  { %2414 = vmatpush3.bf16.msra.mxu1 %v2413_v6  ;;  %2606 = vmatpush3.bf16.msra.mxu0 %v2605_v13  ;;  %v2608_v21 = vpack.c.bf16 %v808_v19, %v807_v18  ;;  %v52_v23 = vld [vmem:[#allocation2 + $0x38] sm:$0xff]  ;;  %v810_v27 = vld [vmem:[#allocation2 + $0x428] sm:$0xff]  ;;  %v53_v30 = vld [vmem:[#allocation2 + $0x40] sm:$0xff]  ;;  %v2911_v62 = vmov 13   ;;  %v2912_v63 = vmov 6   ;;  %v2913_v0 = vmov 14  }
  0x18   :  { %2415 = vmatprep.subr.bf16.mxu1 %v2899_v2  ;;  %2607 = vmatprep.subr.bf16.mxu0 %v2899_v2  ;;  %v2422_v28 = vpack.c.bf16 %v52_v23, %v51_v22  ;;  %v2611_v29 = vpack.c.bf16 %v810_v27, %v809_v26  ;;  %v54_v31 = vld [vmem:[#allocation2 + $0x48] sm:$0xff]  ;;  %v811_v32 = vld [vmem:[#allocation2 + $0x430] sm:$0xff]  ;;  %v812_v33 = vld [vmem:[#allocation2 + $0x438] sm:$0xff]  ;;  %v2914_v1 = vmov 7   ;;  %v2915_v4 = vmov 15  }
  0x19   :  { %2854 = vset.pattern.permute.xlu0 %v2902_v15  ;;  %2856 = vset.pattern.permute.xlu1 %v2903_v16  ;;  %v2425_v36 = vpack.c.bf16 %v54_v31, %v53_v30  ;;  %v2614_v37 = vpack.c.bf16 %v812_v33, %v811_v32  ;;  %v55_v38 = vld [vmem:[#allocation2 + $0x50] sm:$0xff]  ;;  %v56_v39 = vld [vmem:[#allocation2 + $0x58] sm:$0xff]  ;;  %v813_v40 = vld [vmem:[#allocation2 + $0x440] sm:$0xff]  ;;  %v29_v5 = vlaneseq  ;;  %v2916_v16 = vmov 1.0  }
  0x1a   :  { %799 = vperm.xlu0 %2854, %v2954_v3   ;;  %894 = vperm.xlu1 %2856, %v2954_v3   ;;  %v814_v41 = vld [vmem:[#allocation2 + $0x448] sm:$0xff]  ;;  %v2428_v43 = vpack.c.bf16 %v56_v39, %v55_v38  ;;  %v57_v45 = vld [vmem:[#allocation2 + $0x60] sm:$0xff]  ;;  %v815_v47 = vld [vmem:[#allocation2 + $0x450] sm:$0xff] }
  0x1b   :  { %2417 = vmatpush3.bf16.msra.mxu1 %v2416_v12  ;;  %2609 = vmatpush3.bf16.msra.mxu0 %v2608_v21  ;;  %v2617_v44 = vpack.c.bf16 %v814_v41, %v813_v40  ;;  %v58_v46 = vld [vmem:[#allocation2 + $0x68] sm:$0xff]  ;;  %v816_v48 = vld [vmem:[#allocation2 + $0x458] sm:$0xff]  ;;  %v59_v51 = vld [vmem:[#allocation2 + $0x70] sm:$0xff]  ;;  %v2992_v8 = vand.u32 127, %v29_v5 }
  0x1c   :  { %2418 = vmatprep.subr.bf16.mxu1 %v2899_v2  ;;  %2610 = vmatprep.subr.bf16.mxu0 %v2899_v2  ;;  %v2431_v49 = vpack.c.bf16 %v58_v46, %v57_v45  ;;  %v2620_v50 = vpack.c.bf16 %v816_v48, %v815_v47  ;;  %v60_v52 = vld [vmem:[#allocation2 + $0x78] sm:$0xff]  ;;  %v817_v53 = vld [vmem:[#allocation2 + $0x460] sm:$0xff]  ;;  %v818_v54 = vld [vmem:[#allocation2 + $0x468] sm:$0xff] }
  0x1d   :  { %v2434_v56 = vpack.c.bf16 %v60_v52, %v59_v51  ;;  %v2623_v57 = vpack.c.bf16 %v818_v54, %v817_v53  ;;  %v819_v58 = vld [vmem:[#allocation2 + $0x470] sm:$0xff]  ;;  %v820_v59 = vld [vmem:[#allocation2 + $0x478] sm:$0xff]  ;;  %v140_v6 = vld [vmem:[#allocation2 + $0x80] sm:$0xff] }
  0x1e   :  { %2857 = vset.pattern.permute.xlu1 %v2904_v24  ;;  %2858 = vset.pattern.permute.xlu0 %v2905_v25  ;;  %v2626_v60 = vpack.c.bf16 %v820_v59, %v819_v58  ;;  %v141_v7 = vld [vmem:[#allocation2 + $0x88] sm:$0xff]  ;;  %v142_v12 = vld [vmem:[#allocation2 + $0x90] sm:$0xff]  ;;  %v143_v13 = vld [vmem:[#allocation2 + $0x98] sm:$0xff] }
  0x1f   :  { %229 = vperm.xlu1 %2857, %v2954_v3   ;;  %989 = vperm.xlu0 %2858, %v2954_v3   ;;  %v2437_v9 = vpack.c.bf16 %v141_v7, %v140_v6  ;;  %v900_v14 = vld [vmem:[#allocation2 + $0x480] sm:$0xff]  ;;  %v901_v15 = vld [vmem:[#allocation2 + $0x488] sm:$0xff]  ;;  %v2440_v17 = vpack.c.bf16 %v143_v13, %v142_v12  ;;  %v902_v21 = vld [vmem:[#allocation2 + $0x490] sm:$0xff] }
  0x20   :  { %2420 = vmatpush3.bf16.msra.mxu1 %v2419_v20  ;;  %2612 = vmatpush3.bf16.msra.mxu0 %v2611_v29  ;;  %v144_v18 = vld [vmem:[#allocation2 + $0xa0] sm:$0xff]  ;;  %v145_v19 = vld [vmem:[#allocation2 + $0xa8] sm:$0xff]  ;;  %v903_v22 = vld [vmem:[#allocation2 + $0x498] sm:$0xff] }
  0x21   :  { %2421 = vmatprep.subr.bf16.mxu1 %v2899_v2  ;;  %2613 = vmatprep.subr.bf16.mxu0 %v2899_v2  ;;  %v2443_v23 = vpack.c.bf16 %v145_v19, %v144_v18  ;;  %v2632_v24 = vpack.c.bf16 %v903_v22, %v902_v21  ;;  %v146_v25 = vld [vmem:[#allocation2 + $0xb0] sm:$0xff]  ;;  %v147_v26 = vld [vmem:[#allocation2 + $0xb8] sm:$0xff]  ;;  %v904_v27 = vld [vmem:[#allocation2 + $0x4a0] sm:$0xff] }
  0x22   :  { %v2446_v29 = vpack.c.bf16 %v147_v26, %v146_v25  ;;  %v148_v31 = vld [vmem:[#allocation2 + $0xc0] sm:$0xff]  ;;  %v149_v32 = vld [vmem:[#allocation2 + $0xc8] sm:$0xff]  ;;  %v906_v33 = vld [vmem:[#allocation2 + $0x4b0] sm:$0xff] }
  0x23   :  { %2859 = vset.pattern.permute.xlu1 %v2906_v34  ;;  %2861 = vset.pattern.permute.xlu0 %v2907_v35  ;;  %v907_v34 = vld [vmem:[#allocation2 + $0x4b8] sm:$0xff]  ;;  %v2449_v35 = vpack.c.bf16 %v149_v32, %v148_v31  ;;  %v908_v39 = vld [vmem:[#allocation2 + $0x4c0] sm:$0xff]  ;;  %v909_v40 = vld [vmem:[#allocation2 + $0x4c8] sm:$0xff] }
  0x24   :  { %324 = vperm.xlu1 %2859, %v2954_v3   ;;  %2423 = vmatpush3.bf16.msra.mxu1 %v2422_v28  ;;  %v905_v28 = vld [vmem:[#allocation2 + $0x4a8] sm:$0xff]  ;;  %v151_v38 = vld [vmem:[#allocation2 + $0xd8] sm:$0xff]  ;;  %v910_v45 = vld [vmem:[#allocation2 + $0x4d0] sm:$0xff] }
  0x25   :  { %2424 = vmatprep.subr.bf16.mxu1 %v2899_v2  ;;  %419 = vperm.xlu0 %2861, %v2954_v3   ;;  %v2635_v30 = vpack.c.bf16 %v905_v28, %v904_v27  ;;  %v911_v46 = vld [vmem:[#allocation2 + $0x4d8] sm:$0xff]  ;;  %v912_v51 = vld [vmem:[#allocation2 + $0x4e0] sm:$0xff]  ;;  %v913_v52 = vld [vmem:[#allocation2 + $0x4e8] sm:$0xff] }
  0x26   :  { %2615 = vmatpush3.bf16.msra.mxu0 %v2614_v37  ;;  %v150_v37 = vld [vmem:[#allocation2 + $0xd0] sm:$0xff]  ;;  %v2644_v48 = vpack.c.bf16 %v911_v46, %v910_v45  ;;  %v915_v59 = vld [vmem:[#allocation2 + $0x4f8] sm:$0xff]  ;;  %v239_v7 = vld [vmem:[#allocation2 + $0x120] sm:$0xff] }
  0x27   :  { %2616 = vmatprep.subr.bf16.mxu0 %v2899_v2  ;;  %v2452_v41 = vpack.c.bf16 %v151_v38, %v150_v37  ;;  %v914_v58 = vld [vmem:[#allocation2 + $0x4f0] sm:$0xff]  ;;  %v998_v12 = vld [vmem:[#allocation2 + $0x518] sm:$0xff]  ;;  %v1000_v18 = vld [vmem:[#allocation2 + $0x528] sm:$0xff] }
  0x28   :  { %2860 = vset.pattern.permute.xlu1 %v2908_v42  ;;  %2426 = vmatpush3.bf16.msra.mxu1 %v2425_v36  ;;  %v2638_v36 = vpack.c.bf16 %v907_v34, %v906_v33  ;;  %v2641_v42 = vpack.c.bf16 %v909_v40, %v908_v39  ;;  %v243_v21 = vld [vmem:[#allocation2 + $0x140] sm:$0xff]  ;;  %v244_v22 = vld [vmem:[#allocation2 + $0x148] sm:$0xff]  ;;  %v245_v27 = vld [vmem:[#allocation2 + $0x150] sm:$0xff] }
  0x29   :  { %1084 = vperm.xlu1 %2860, %v2954_v3   ;;  %2427 = vmatprep.subr.bf16.mxu1 %v2899_v2  ;;  %v2473_v25 = vpack.c.bf16 %v244_v22, %v243_v21  ;;  %v246_v28 = vld [vmem:[#allocation2 + $0x158] sm:$0xff]  ;;  %v247_v33 = vld [vmem:[#allocation2 + $0x160] sm:$0xff]  ;;  %v248_v34 = vld [vmem:[#allocation2 + $0x168] sm:$0xff] }
  0x2a   :  { %2618 = vmatpush3.bf16.msra.mxu0 %v2617_v44  ;;  %2864 = vset.pattern.permute.xlu0 %v2911_v62  ;;  %v153_v44 = vld [vmem:[#allocation2 + $0xe8] sm:$0xff]  ;;  %v237_v62 = vld [vmem:[#allocation2 + $0x110] sm:$0xff]  ;;  %v2476_v31 = vpack.c.bf16 %v246_v28, %v245_v27  ;;  %v2479_v37 = vpack.c.bf16 %v248_v34, %v247_v33  ;;  %v250_v40 = vld [vmem:[#allocation2 + $0x178] sm:$0xff] }
  0x2b   :  { %2619 = vmatprep.subr.bf16.mxu0 %v2899_v2  ;;  %1274 = vperm.xlu0 %2864, %v2954_v3   ;;  %v249_v39 = vld [vmem:[#allocation2 + $0x170] sm:$0xff]  ;;  %v330_v46 = vld [vmem:[#allocation2 + $0x180] sm:$0xff] }
  0x2c   :  { %2429 = vmatpush3.bf16.msra.mxu1 %v2428_v43  ;;  %v152_v43 = vld [vmem:[#allocation2 + $0xe0] sm:$0xff] }
  0x2d   :  { %2430 = vmatprep.subr.bf16.mxu1 %v2899_v2  ;;  %2862 = vset.pattern.permute.xlu1 %v2909_v55  ;;  %v2455_v47 = vpack.c.bf16 %v153_v44, %v152_v43  ;;  %v2647_v55 = vpack.c.bf16 %v913_v52, %v912_v51  ;;  %v2482_v43 = vpack.c.bf16 %v250_v40, %v249_v39  ;;  %v332_v52 = vld [vmem:[#allocation2 + $0x190] sm:$0xff]  ;;  %v1105_v39 = vld [vmem:[#allocation2 + $0x5f8] sm:$0xff] }
  0x2e   :  { %1179 = vperm.xlu1 %2862, %v2954_v3   ;;  %2621 = vmatpush3.bf16.msra.mxu0 %v2620_v50  ;;  %v155_v50 = vld [vmem:[#allocation2 + $0xf8] sm:$0xff] }
  0x2f   :  { %2622 = vmatprep.subr.bf16.mxu0 %v2899_v2  ;;  %2867 = vset.pattern.permute.xlu0 %v2914_v1  ;;  %v995_v1 = vld [vmem:[#allocation2 + $0x500] sm:$0xff] }
  0x30   :  { %2432 = vmatpush3.bf16.msra.mxu1 %v2431_v49  ;;  %704 = vperm.xlu0 %2867, %v2954_v3   ;;  %v154_v49 = vld [vmem:[#allocation2 + $0xf0] sm:$0xff] }
  0x31   :  { %2433 = vmatprep.subr.bf16.mxu1 %v2899_v2  ;;  %v2458_v53 = vpack.c.bf16 %v155_v50, %v154_v49  ;;  %v1010_v49 = vld [vmem:[#allocation2 + $0x578] sm:$0xff] }
  0x32   :  { %2624 = vmatpush3.bf16.msra.mxu0 %v2623_v57  ;;  %2863 = vset.pattern.permute.xlu1 %v2910_v61  ;;  %v236_v57 = vld [vmem:[#allocation2 + $0x108] sm:$0xff]  ;;  %v2650_v61 = vpack.c.bf16 %v915_v59, %v914_v58  ;;  %v334_v59 = vld [vmem:[#allocation2 + $0x1a0] sm:$0xff] }
  0x33   :  { %2625 = vmatprep.subr.bf16.mxu0 %v2899_v2  ;;  %514 = vperm.xlu1 %2863, %v2954_v3  }
  0x34   :  { %2435 = vmatpush3.bf16.msra.mxu1 %v2434_v56  ;;  %2869 = vset.pattern.permute.xlu0 %v2915_v4  ;;  %v235_v56 = vld [vmem:[#allocation2 + $0x100] sm:$0xff] }
  0x35   :  { %2436 = vmatprep.subr.bf16.mxu1 %v2899_v2 }
  0x36   :  { %2627 = vmatpush3.bf16.msra.mxu0 %v2626_v60  ;;  %v2461_v60 = vpack.c.bf16 %v236_v57, %v235_v56  ;;  %v1091_v56 = vld [vmem:[#allocation2 + $0x588] sm:$0xff] }
  0x37   :  { %2628 = vmatprep.subr.bf16.mxu0 %v2899_v2  ;;  %2865 = vset.pattern.permute.xlu1 %v2912_v63  ;;  %v238_v63 = vld [vmem:[#allocation2 + $0x118] sm:$0xff] }
  0x38   :  { %609 = vperm.xlu1 %2865, %v2954_v3   ;;  %v2464_v5 = vpack.c.bf16 %v238_v63, %v237_v62  ;;  %v1093_v62 = vld [vmem:[#allocation2 + $0x598] sm:$0xff] }
  0x3c   :  { %2866 = vset.pattern.permute.xlu1 %v2913_v0 }
  0x3d   :  { %1369 = vperm.xlu1 %2866, %v2954_v3  }
  0x41   :  { %2868 = vset.pattern.permute.xlu1 %v2915_v4  ;;  %v996_v4 = vld [vmem:[#allocation2 + $0x508] sm:$0xff] }
  0x42   :  { %1464 = vperm.xlu1 %2868, %v2954_v3   ;;  %v2629_v3 = vpack.c.bf16 %v901_v15, %v900_v14  ;;  %v2653_v6 = vpack.c.bf16 %v996_v4, %v995_v1  ;;  %v241_v15 = vld [vmem:[#allocation2 + $0x130] sm:$0xff]  ;;  %v337_v4 = vld [vmem:[#allocation2 + $0x1b8] sm:$0xff] }
  0x43   :  { %v336_v1 = vld [vmem:[#allocation2 + $0x1b0] sm:$0xff] }
  0x94   :  { %v41_v10 = vpop.permute.xlu0 %40  ;;  %v135_v54 = vpop.permute.xlu1 %134 }
  0x95   :  { %vm42_vm1 = vcmp.eq.s32.totalorder %v2992_v8, %v41_v10  ;;  %vm136_vm3 = vcmp.eq.s32.totalorder %v2992_v8, %v135_v54  ;;  %v997_v10 = vld [vmem:[#allocation2 + $0x510] sm:$0xff] }
  0x96   :  { %1885 = vmatmul.mubr.msk.f32.vlgmr.msra.gmra.mrb[0].mxu1 %vm42_vm1, %v2916_v16  ;;  %v2656_v14 = vpack.c.bf16 %v998_v12, %v997_v10  ;;  %v338_v10 = vld [vmem:[#allocation2 + $0x1c0] sm:$0xff]  ;;  %v339_v12 = vld [vmem:[#allocation2 + $0x1c8] sm:$0xff] }
  0x97   :  { %2438 = vmatpush3.bf16.msra.mxu1 %v2437_v9  ;;  %1919 = vmatprep.mubr.msk.f32.mxu1 %vm2900_vm0, %v2901_v11  ;;  %v240_v9 = vld [vmem:[#allocation2 + $0x128] sm:$0xff] }
  0x98   :  { %2439 = vmatprep.subr.bf16.mxu1 %v2899_v2  ;;  %v2467_v13 = vpack.c.bf16 %v240_v9, %v239_v7  ;;  %v2494_v7 = vpack.c.bf16 %v337_v4, %v336_v1 }
  0x99   :  { %v800_v20 = vpop.permute.xlu0 %799  ;;  %v895_v0 = vpop.permute.xlu1 %894 }
  0x9a   :  { %vm801_vm2 = vcmp.eq.s32.totalorder %v2992_v8, %v800_v20  ;;  %vm896_vm4 = vcmp.eq.s32.totalorder %v2992_v8, %v895_v0 }
  0x9b   :  { %2441 = vmatpush3.bf16.msra.mxu1 %v2440_v17  ;;  %2165 = vmatmul.mubr.msk.f32.vlgmr.msra.gmra.mrb[0].mxu0 %vm801_vm2, %v2916_v16  ;;  %v242_v17 = vld [vmem:[#allocation2 + $0x138] sm:$0xff] }
  0x9c   :  { %2630 = vmatpush3.bf16.msra.mxu0 %v2629_v3  ;;  %2442 = vmatprep.subr.bf16.mxu1 %v2899_v2  ;;  %v999_v3 = vld [vmem:[#allocation2 + $0x520] sm:$0xff]  ;;  %v2470_v19 = vpack.c.bf16 %v242_v17, %v241_v15  ;;  %v2497_v15 = vpack.c.bf16 %v339_v12, %v338_v10 }
  0x9d   :  { %2631 = vmatprep.subr.bf16.mxu0 %v2899_v2  ;;  %2199 = vmatprep.mubr.msk.f32.mxu0 %vm2900_vm0, %v2901_v11  ;;  %v2659_v20 = vpack.c.bf16 %v1000_v18, %v999_v3  ;;  %v340_v3 = vld [vmem:[#allocation2 + $0x1d0] sm:$0xff]  ;;  %v341_v18 = vld [vmem:[#allocation2 + $0x1d8] sm:$0xff] }
  0x9e   :  { %v230_v45 = vpop.permute.xlu1 %229  ;;  %v990_v54 = vpop.permute.xlu0 %989  ;;  %v2500_v21 = vpack.c.bf16 %v341_v18, %v340_v3 }
  0x9f   :  { %2444 = vmatpush3.bf16.msra.mxu1 %v2443_v23  ;;  %v1001_v23 = vld [vmem:[#allocation2 + $0x530] sm:$0xff]  ;;  %vm231_vm5 = vcmp.eq.s32.totalorder %v2992_v8, %v230_v45  ;;  %vm991_vm6 = vcmp.eq.s32.totalorder %v2992_v8, %v990_v54  ;;  %v1185_v45 = vld [vmem:[#allocation2 + $0x600] sm:$0xff] }
  0xa0   :  { %2633 = vmatpush3.bf16.msra.mxu0 %v2632_v24  ;;  %2445 = vmatprep.subr.bf16.mxu1 %v2899_v2  ;;  %v1002_v24 = vld [vmem:[#allocation2 + $0x538] sm:$0xff] }
  0xa1   :  { %2634 = vmatprep.subr.bf16.mxu0 %v2899_v2  ;;  %v2662_v26 = vpack.c.bf16 %v1002_v24, %v1001_v23  ;;  %v342_v23 = vld [vmem:[#allocation2 + $0x1e0] sm:$0xff]  ;;  %v343_v24 = vld [vmem:[#allocation2 + $0x1e8] sm:$0xff] }
  0xa2   :  { %v2503_v27 = vpack.c.bf16 %v343_v24, %v342_v23 }
  0xa3   :  { %2447 = vmatpush3.bf16.msra.mxu1 %v2446_v29  ;;  %v1003_v29 = vld [vmem:[#allocation2 + $0x540] sm:$0xff]  ;;  %v325_v34 = vpop.permute.xlu1 %324 }
  0xa4   :  { %2636 = vmatpush3.bf16.msra.mxu0 %v2635_v30  ;;  %2448 = vmatprep.subr.bf16.mxu1 %v2899_v2  ;;  %v1004_v30 = vld [vmem:[#allocation2 + $0x548] sm:$0xff]  ;;  %vm326_vm7 = vcmp.eq.s32.totalorder %v2992_v8, %v325_v34 }
  0xa5   :  { %2637 = vmatprep.subr.bf16.mxu0 %v2899_v2  ;;  %v2665_v32 = vpack.c.bf16 %v1004_v30, %v1003_v29  ;;  %v344_v29 = vld [vmem:[#allocation2 + $0x1f0] sm:$0xff]  ;;  %v345_v30 = vld [vmem:[#allocation2 + $0x1f8] sm:$0xff] }
  0xa6   :  { %v2506_v33 = vpack.c.bf16 %v345_v30, %v344_v29  ;;  %v1200_v29 = vld [vmem:[#allocation2 + $0x678] sm:$0xff] }
  0xa7   :  { %2450 = vmatpush3.bf16.msra.mxu1 %v2449_v35  ;;  %v1005_v35 = vld [vmem:[#allocation2 + $0x550] sm:$0xff] }
  0xa8   :  { %2639 = vmatpush3.bf16.msra.mxu0 %v2638_v36  ;;  %2451 = vmatprep.subr.bf16.mxu1 %v2899_v2  ;;  %v1006_v36 = vld [vmem:[#allocation2 + $0x558] sm:$0xff] }
  0xa9   :  { %2640 = vmatprep.subr.bf16.mxu0 %v2899_v2  ;;  %v2668_v38 = vpack.c.bf16 %v1006_v36, %v1005_v35  ;;  %v425_v36 = vld [vmem:[#allocation2 + $0x200] sm:$0xff] }
  0xab   :  { %2453 = vmatpush3.bf16.msra.mxu1 %v2452_v41  ;;  %v1007_v41 = vld [vmem:[#allocation2 + $0x560] sm:$0xff] }
  0xac   :  { %2642 = vmatpush3.bf16.msra.mxu0 %v2641_v42  ;;  %2454 = vmatprep.subr.bf16.mxu1 %v2899_v2  ;;  %v1008_v42 = vld [vmem:[#allocation2 + $0x568] sm:$0xff] }
  0xad   :  { %2643 = vmatprep.subr.bf16.mxu0 %v2899_v2  ;;  %v2671_v44 = vpack.c.bf16 %v1008_v42, %v1007_v41  ;;  %v427_v42 = vld [vmem:[#allocation2 + $0x210] sm:$0xff] }
  0xaf   :  { %2456 = vmatpush3.bf16.msra.mxu1 %v2455_v47  ;;  %v331_v47 = vld [vmem:[#allocation2 + $0x188] sm:$0xff] }
  0xb0   :  { %2645 = vmatpush3.bf16.msra.mxu0 %v2644_v48  ;;  %2457 = vmatprep.subr.bf16.mxu1 %v2899_v2  ;;  %v1009_v48 = vld [vmem:[#allocation2 + $0x570] sm:$0xff]  ;;  %v2485_v50 = vpack.c.bf16 %v331_v47, %v330_v46  ;;  %v1186_v46 = vld [vmem:[#allocation2 + $0x608] sm:$0xff] }
  0xb1   :  { %2646 = vmatprep.subr.bf16.mxu0 %v2899_v2  ;;  %v2674_v51 = vpack.c.bf16 %v1010_v49, %v1009_v48  ;;  %v2701_v48 = vpack.c.bf16 %v1186_v46, %v1185_v45  ;;  %v429_v49 = vld [vmem:[#allocation2 + $0x220] sm:$0xff]  ;;  %v526_v45 = vld [vmem:[#allocation2 + $0x2b0] sm:$0xff]  ;;  %v527_v46 = vld [vmem:[#allocation2 + $0x2b8] sm:$0xff] }
  0xb3   :  { %2459 = vmatpush3.bf16.msra.mxu1 %v2458_v53  ;;  %v333_v53 = vld [vmem:[#allocation2 + $0x198] sm:$0xff] }
  0xb4   :  { %2648 = vmatpush3.bf16.msra.mxu0 %v2647_v55  ;;  %2460 = vmatprep.subr.bf16.mxu1 %v2899_v2  ;;  %v1090_v55 = vld [vmem:[#allocation2 + $0x580] sm:$0xff]  ;;  %v2488_v57 = vpack.c.bf16 %v333_v53, %v332_v52  ;;  %v1188_v52 = vld [vmem:[#allocation2 + $0x618] sm:$0xff] }
  0xb5   :  { %2649 = vmatprep.subr.bf16.mxu0 %v2899_v2  ;;  %v2677_v58 = vpack.c.bf16 %v1091_v56, %v1090_v55  ;;  %v431_v55 = vld [vmem:[#allocation2 + $0x230] sm:$0xff]  ;;  %v432_v56 = vld [vmem:[#allocation2 + $0x238] sm:$0xff] }
  0xb6   :  { %1920 = vmatmul.mubr.msk.f32.vlgmr.msra.gmra.mrb[0].mxu1 %vm136_vm3, %v2916_v16 }
  0xb7   :  { %2462 = vmatpush3.bf16.msra.mxu1 %v2461_v60  ;;  %1954 = vmatprep.mubr.msk.f32.mxu1 %vm2900_vm0, %v2901_v11  ;;  %v335_v60 = vld [vmem:[#allocation2 + $0x1a8] sm:$0xff] }
  0xb8   :  { %2651 = vmatpush3.bf16.msra.mxu0 %v2650_v61  ;;  %2463 = vmatprep.subr.bf16.mxu1 %v2899_v2  ;;  %v1092_v61 = vld [vmem:[#allocation2 + $0x590] sm:$0xff]  ;;  %v2491_v63 = vpack.c.bf16 %v335_v60, %v334_v59  ;;  %v2518_v59 = vpack.c.bf16 %v432_v56, %v431_v55 }
  0xb9   :  { %2652 = vmatprep.subr.bf16.mxu0 %v2899_v2  ;;  %v2680_v0 = vpack.c.bf16 %v1093_v62, %v1092_v61  ;;  %v433_v61 = vld [vmem:[#allocation2 + $0x240] sm:$0xff]  ;;  %v434_v62 = vld [vmem:[#allocation2 + $0x248] sm:$0xff] }
  0xba   :  { %v2521_v1 = vpack.c.bf16 %v434_v62, %v433_v61 }
  0xbb   :  { %2465 = vmatpush3.bf16.msra.mxu1 %v2464_v5  ;;  %2200 = vmatmul.mubr.msk.f32.vlgmr.msra.gmra.mrb[0].mxu0 %vm896_vm4, %v2916_v16  ;;  %v1094_v5 = vld [vmem:[#allocation2 + $0x5a0] sm:$0xff] }
  0xbc   :  { %2654 = vmatpush3.bf16.msra.mxu0 %v2653_v6  ;;  %2466 = vmatprep.subr.bf16.mxu1 %v2899_v2  ;;  %v1095_v6 = vld [vmem:[#allocation2 + $0x5a8] sm:$0xff] }
  0xbd   :  { %2655 = vmatprep.subr.bf16.mxu0 %v2899_v2  ;;  %2234 = vmatprep.mubr.msk.f32.mxu0 %vm2900_vm0, %v2901_v11  ;;  %v2683_v9 = vpack.c.bf16 %v1095_v6, %v1094_v5  ;;  %v435_v5 = vld [vmem:[#allocation2 + $0x250] sm:$0xff]  ;;  %v436_v6 = vld [vmem:[#allocation2 + $0x258] sm:$0xff] }
  0xbe   :  { %v2524_v10 = vpack.c.bf16 %v436_v6, %v435_v5 }
  0xbf   :  { %2468 = vmatpush3.bf16.msra.mxu1 %v2467_v13  ;;  %v1096_v13 = vld [vmem:[#allocation2 + $0x5b0] sm:$0xff] }
  0xc0   :  { %2657 = vmatpush3.bf16.msra.mxu0 %v2656_v14  ;;  %2469 = vmatprep.subr.bf16.mxu1 %v2899_v2  ;;  %v1097_v14 = vld [vmem:[#allocation2 + $0x5b8] sm:$0xff] }
  0xc1   :  { %2658 = vmatprep.subr.bf16.mxu0 %v2899_v2  ;;  %v2686_v17 = vpack.c.bf16 %v1097_v14, %v1096_v13  ;;  %v437_v13 = vld [vmem:[#allocation2 + $0x260] sm:$0xff]  ;;  %v438_v14 = vld [vmem:[#allocation2 + $0x268] sm:$0xff] }
  0xc2   :  { %v2527_v3 = vpack.c.bf16 %v438_v14, %v437_v13 }
  0xc3   :  { %2471 = vmatpush3.bf16.msra.mxu1 %v2470_v19  ;;  %v1098_v19 = vld [vmem:[#allocation2 + $0x5c0] sm:$0xff] }
  0xc4   :  { %2660 = vmatpush3.bf16.msra.mxu0 %v2659_v20  ;;  %2472 = vmatprep.subr.bf16.mxu1 %v2899_v2  ;;  %v1099_v20 = vld [vmem:[#allocation2 + $0x5c8] sm:$0xff] }
  0xc5   :  { %2661 = vmatprep.subr.bf16.mxu0 %v2899_v2  ;;  %v2689_v22 = vpack.c.bf16 %v1099_v20, %v1098_v19  ;;  %v439_v19 = vld [vmem:[#allocation2 + $0x270] sm:$0xff]  ;;  %v440_v20 = vld [vmem:[#allocation2 + $0x278] sm:$0xff] }
  0xc6   :  { %v2530_v23 = vpack.c.bf16 %v440_v20, %v439_v19  ;;  %v1295_v19 = vld [vmem:[#allocation2 + $0x6f8] sm:$0xff] }
  0xc7   :  { %2474 = vmatpush3.bf16.msra.mxu1 %v2473_v25  ;;  %v1100_v25 = vld [vmem:[#allocation2 + $0x5d0] sm:$0xff] }
  0xc8   :  { %2663 = vmatpush3.bf16.msra.mxu0 %v2662_v26  ;;  %2475 = vmatprep.subr.bf16.mxu1 %v2899_v2  ;;  %v1101_v26 = vld [vmem:[#allocation2 + $0x5d8] sm:$0xff] }
  0xc9   :  { %2664 = vmatprep.subr.bf16.mxu0 %v2899_v2  ;;  %v2692_v28 = vpack.c.bf16 %v1101_v26, %v1100_v25  ;;  %v420_v25 = vpop.permute.xlu0 %419  ;;  %v520_v26 = vld [vmem:[#allocation2 + $0x280] sm:$0xff] }
  0xca   :  { %vm421_vm9 = vcmp.eq.s32.totalorder %v2992_v8, %v420_v25  ;;  %v1375_v25 = vld [vmem:[#allocation2 + $0x700] sm:$0xff] }
  0xcb   :  { %2477 = vmatpush3.bf16.msra.mxu1 %v2476_v31  ;;  %v1102_v31 = vld [vmem:[#allocation2 + $0x5e0] sm:$0xff] }
  0xcc   :  { %2666 = vmatpush3.bf16.msra.mxu0 %v2665_v32  ;;  %2478 = vmatprep.subr.bf16.mxu1 %v2899_v2  ;;  %v1103_v32 = vld [vmem:[#allocation2 + $0x5e8] sm:$0xff] }
  0xcd   :  { %2667 = vmatprep.subr.bf16.mxu0 %v2899_v2  ;;  %v2695_v35 = vpack.c.bf16 %v1103_v32, %v1102_v31  ;;  %v522_v32 = vld [vmem:[#allocation2 + $0x290] sm:$0xff] }
  0xcf   :  { %2480 = vmatpush3.bf16.msra.mxu1 %v2479_v37  ;;  %v426_v37 = vld [vmem:[#allocation2 + $0x208] sm:$0xff] }
  0xd0   :  { %2669 = vmatpush3.bf16.msra.mxu0 %v2668_v38  ;;  %2481 = vmatprep.subr.bf16.mxu1 %v2899_v2  ;;  %v1104_v38 = vld [vmem:[#allocation2 + $0x5f0] sm:$0xff]  ;;  %v2509_v40 = vpack.c.bf16 %v426_v37, %v425_v36  ;;  %v1281_v36 = vld [vmem:[#allocation2 + $0x688] sm:$0xff] }
  0xd1   :  { %2670 = vmatprep.subr.bf16.mxu0 %v2899_v2  ;;  %v2698_v41 = vpack.c.bf16 %v1105_v39, %v1104_v38  ;;  %v524_v39 = vld [vmem:[#allocation2 + $0x2a0] sm:$0xff] }
  0xd3   :  { %2483 = vmatpush3.bf16.msra.mxu1 %v2482_v43  ;;  %v428_v43 = vld [vmem:[#allocation2 + $0x218] sm:$0xff] }
  0xd4   :  { %2672 = vmatpush3.bf16.msra.mxu0 %v2671_v44  ;;  %2484 = vmatprep.subr.bf16.mxu1 %v2899_v2  ;;  %v1085_v44 = vpop.permute.xlu1 %1084  ;;  %v2512_v47 = vpack.c.bf16 %v428_v43, %v427_v42  ;;  %v1283_v42 = vld [vmem:[#allocation2 + $0x698] sm:$0xff] }
  0xd5   :  { %2673 = vmatprep.subr.bf16.mxu0 %v2899_v2  ;;  %vm1086_vm8 = vcmp.eq.s32.totalorder %v2992_v8, %v1085_v44 }
  0xd6   :  { %1955 = vmatmul.mubr.msk.f32.vlgmr.msra.gmra.mrb[0].mxu1 %vm231_vm5, %v2916_v16 }
  0xd7   :  { %2486 = vmatpush3.bf16.msra.mxu1 %v2485_v50  ;;  %1989 = vmatprep.mubr.msk.f32.mxu1 %vm2900_vm0, %v2901_v11  ;;  %v430_v50 = vld [vmem:[#allocation2 + $0x228] sm:$0xff] }
  0xd8   :  { %2675 = vmatpush3.bf16.msra.mxu0 %v2674_v51  ;;  %2487 = vmatprep.subr.bf16.mxu1 %v2899_v2  ;;  %v1187_v51 = vld [vmem:[#allocation2 + $0x610] sm:$0xff]  ;;  %v2515_v53 = vpack.c.bf16 %v430_v50, %v429_v49  ;;  %v1180_v34 = vpop.permute.xlu1 %1179  ;;  %v2542_v49 = vpack.c.bf16 %v527_v46, %v526_v45 }
  0xd9   :  { %2676 = vmatprep.subr.bf16.mxu0 %v2899_v2  ;;  %v2704_v54 = vpack.c.bf16 %v1188_v52, %v1187_v51  ;;  %vm1181_vm10 = vcmp.eq.s32.totalorder %v2992_v8, %v1180_v34  ;;  %v528_v51 = vld [vmem:[#allocation2 + $0x2c0] sm:$0xff]  ;;  %v529_v52 = vld [vmem:[#allocation2 + $0x2c8] sm:$0xff] }
  0xda   :  { %v2545_v55 = vpack.c.bf16 %v529_v52, %v528_v51 }
  0xdb   :  { %2489 = vmatpush3.bf16.msra.mxu1 %v2488_v57  ;;  %2235 = vmatmul.mubr.msk.f32.vlgmr.msra.gmra.mrb[0].mxu0 %vm991_vm6, %v2916_v16  ;;  %v1189_v57 = vld [vmem:[#allocation2 + $0x620] sm:$0xff] }
  0xdc   :  { %2678 = vmatpush3.bf16.msra.mxu0 %v2677_v58  ;;  %2490 = vmatprep.subr.bf16.mxu1 %v2899_v2  ;;  %v1190_v58 = vld [vmem:[#allocation2 + $0x628] sm:$0xff] }
  0xdd   :  { %2679 = vmatprep.subr.bf16.mxu0 %v2899_v2  ;;  %2269 = vmatprep.mubr.msk.f32.mxu0 %vm2900_vm0, %v2901_v11  ;;  %v2707_v60 = vpack.c.bf16 %v1190_v58, %v1189_v57  ;;  %v530_v57 = vld [vmem:[#allocation2 + $0x2d0] sm:$0xff]  ;;  %v531_v58 = vld [vmem:[#allocation2 + $0x2d8] sm:$0xff] }
  0xde   :  { %v2548_v61 = vpack.c.bf16 %v531_v58, %v530_v57 }
  0xdf   :  { %2492 = vmatpush3.bf16.msra.mxu1 %v2491_v63  ;;  %v1191_v63 = vld [vmem:[#allocation2 + $0x630] sm:$0xff] }
  0xe0   :  { %2681 = vmatpush3.bf16.msra.mxu0 %v2680_v0  ;;  %2493 = vmatprep.subr.bf16.mxu1 %v2899_v2  ;;  %v1192_v0 = vld [vmem:[#allocation2 + $0x638] sm:$0xff] }
  0xe1   :  { %2682 = vmatprep.subr.bf16.mxu0 %v2899_v2  ;;  %v2710_v4 = vpack.c.bf16 %v1192_v0, %v1191_v63  ;;  %v532_v63 = vld [vmem:[#allocation2 + $0x2e0] sm:$0xff]  ;;  %v533_v0 = vld [vmem:[#allocation2 + $0x2e8] sm:$0xff] }
  0xe2   :  { %v2551_v5 = vpack.c.bf16 %v533_v0, %v532_v63 }
  0xe3   :  { %2495 = vmatpush3.bf16.msra.mxu1 %v2494_v7  ;;  %v1193_v7 = vld [vmem:[#allocation2 + $0x640] sm:$0xff] }
  0xe4   :  { %2684 = vmatpush3.bf16.msra.mxu0 %v2683_v9  ;;  %2496 = vmatprep.subr.bf16.mxu1 %v2899_v2  ;;  %v1194_v9 = vld [vmem:[#allocation2 + $0x648] sm:$0xff] }
  0xe5   :  { %2685 = vmatprep.subr.bf16.mxu0 %v2899_v2  ;;  %v2713_v12 = vpack.c.bf16 %v1194_v9, %v1193_v7  ;;  %v534_v7 = vld [vmem:[#allocation2 + $0x2f0] sm:$0xff]  ;;  %v535_v9 = vld [vmem:[#allocation2 + $0x2f8] sm:$0xff] }
  0xe6   :  { %v2554_v13 = vpack.c.bf16 %v535_v9, %v534_v7  ;;  %v1390_v7 = vld [vmem:[#allocation2 + $0x778] sm:$0xff] }
  0xe7   :  { %2498 = vmatpush3.bf16.msra.mxu1 %v2497_v15  ;;  %v1195_v15 = vld [vmem:[#allocation2 + $0x650] sm:$0xff] }
  0xe8   :  { %2687 = vmatpush3.bf16.msra.mxu0 %v2686_v17  ;;  %2499 = vmatprep.subr.bf16.mxu1 %v2899_v2  ;;  %v1196_v17 = vld [vmem:[#allocation2 + $0x658] sm:$0xff] }
  0xe9   :  { %2688 = vmatprep.subr.bf16.mxu0 %v2899_v2  ;;  %v2716_v18 = vpack.c.bf16 %v1196_v17, %v1195_v15  ;;  %v515_v15 = vpop.permute.xlu1 %514  ;;  %v615_v17 = vld [vmem:[#allocation2 + $0x300] sm:$0xff] }
  0xea   :  { %vm516_vm11 = vcmp.eq.s32.totalorder %v2992_v8, %v515_v15  ;;  %v1470_v15 = vld [vmem:[#allocation2 + $0x780] sm:$0xff] }
  0xeb   :  { %2501 = vmatpush3.bf16.msra.mxu1 %v2500_v21  ;;  %v1197_v21 = vld [vmem:[#allocation2 + $0x660] sm:$0xff] }
  0xec   :  { %2690 = vmatpush3.bf16.msra.mxu0 %v2689_v22  ;;  %2502 = vmatprep.subr.bf16.mxu1 %v2899_v2  ;;  %v1198_v22 = vld [vmem:[#allocation2 + $0x668] sm:$0xff] }
  0xed   :  { %2691 = vmatprep.subr.bf16.mxu0 %v2899_v2  ;;  %v2719_v24 = vpack.c.bf16 %v1198_v22, %v1197_v21  ;;  %v617_v22 = vld [vmem:[#allocation2 + $0x310] sm:$0xff]  ;;  %v610_v0 = vpop.permute.xlu1 %609 }
  0xee   :  { %vm611_vm13 = vcmp.eq.s32.totalorder %v2992_v8, %v610_v0 }
  0xef   :  { %2504 = vmatpush3.bf16.msra.mxu1 %v2503_v27  ;;  %v521_v27 = vld [vmem:[#allocation2 + $0x288] sm:$0xff] }
  0xf0   :  { %2693 = vmatpush3.bf16.msra.mxu0 %v2692_v28  ;;  %2505 = vmatprep.subr.bf16.mxu1 %v2899_v2  ;;  %v1199_v28 = vld [vmem:[#allocation2 + $0x670] sm:$0xff]  ;;  %v2533_v30 = vpack.c.bf16 %v521_v27, %v520_v26  ;;  %v1376_v26 = vld [vmem:[#allocation2 + $0x708] sm:$0xff] }
  0xf1   :  { %2694 = vmatprep.subr.bf16.mxu0 %v2899_v2  ;;  %v2722_v31 = vpack.c.bf16 %v1200_v29, %v1199_v28  ;;  %v2749_v28 = vpack.c.bf16 %v1376_v26, %v1375_v25  ;;  %v619_v29 = vld [vmem:[#allocation2 + $0x320] sm:$0xff]  ;;  %v716_v25 = vld [vmem:[#allocation2 + $0x3b0] sm:$0xff]  ;;  %v717_v26 = vld [vmem:[#allocation2 + $0x3b8] sm:$0xff] }
  0xf3   :  { %2507 = vmatpush3.bf16.msra.mxu1 %v2506_v33  ;;  %v523_v33 = vld [vmem:[#allocation2 + $0x298] sm:$0xff] }
  0xf4   :  { %2696 = vmatpush3.bf16.msra.mxu0 %v2695_v35  ;;  %2508 = vmatprep.subr.bf16.mxu1 %v2899_v2  ;;  %v1280_v35 = vld [vmem:[#allocation2 + $0x680] sm:$0xff]  ;;  %v2536_v37 = vpack.c.bf16 %v523_v33, %v522_v32  ;;  %v1378_v32 = vld [vmem:[#allocation2 + $0x718] sm:$0xff] }
  0xf5   :  { %2697 = vmatprep.subr.bf16.mxu0 %v2899_v2  ;;  %v2725_v38 = vpack.c.bf16 %v1281_v36, %v1280_v35  ;;  %v621_v35 = vld [vmem:[#allocation2 + $0x330] sm:$0xff]  ;;  %v622_v36 = vld [vmem:[#allocation2 + $0x338] sm:$0xff] }
  0xf6   :  { %1990 = vmatmul.mubr.msk.f32.vlgmr.msra.gmra.mrb[0].mxu1 %vm326_vm7, %v2916_v16 }
  0xf7   :  { %2510 = vmatpush3.bf16.msra.mxu1 %v2509_v40  ;;  %2024 = vmatprep.mubr.msk.f32.mxu1 %vm2900_vm0, %v2901_v11  ;;  %v525_v40 = vld [vmem:[#allocation2 + $0x2a8] sm:$0xff] }
  0xf8   :  { %2699 = vmatpush3.bf16.msra.mxu0 %v2698_v41  ;;  %2511 = vmatprep.subr.bf16.mxu1 %v2899_v2  ;;  %v1282_v41 = vld [vmem:[#allocation2 + $0x690] sm:$0xff]  ;;  %v2539_v43 = vpack.c.bf16 %v525_v40, %v524_v39  ;;  %v2566_v39 = vpack.c.bf16 %v622_v36, %v621_v35 }
  0xf9   :  { %2700 = vmatprep.subr.bf16.mxu0 %v2899_v2  ;;  %v2728_v44 = vpack.c.bf16 %v1283_v42, %v1282_v41  ;;  %v623_v41 = vld [vmem:[#allocation2 + $0x340] sm:$0xff]  ;;  %v624_v42 = vld [vmem:[#allocation2 + $0x348] sm:$0xff] }
  0xfa   :  { %v2569_v45 = vpack.c.bf16 %v624_v42, %v623_v41  ;;  %v722_v42 = vld [vmem:[#allocation2 + $0x3e0] sm:$0xff] }
  0xfb   :  { %2513 = vmatpush3.bf16.msra.mxu1 %v2512_v47  ;;  %2270 = vmatmul.mubr.msk.f32.vlgmr.msra.gmra.mrb[0].mxu0 %vm1086_vm8, %v2916_v16  ;;  %v1284_v47 = vld [vmem:[#allocation2 + $0x6a0] sm:$0xff] }
  0xfc   :  { %2702 = vmatpush3.bf16.msra.mxu0 %v2701_v48  ;;  %2514 = vmatprep.subr.bf16.mxu1 %v2899_v2  ;;  %v1285_v48 = vld [vmem:[#allocation2 + $0x6a8] sm:$0xff] }
  0xfd   :  { %2703 = vmatprep.subr.bf16.mxu0 %v2899_v2  ;;  %2304 = vmatprep.mubr.msk.f32.mxu0 %vm2900_vm0, %v2901_v11  ;;  %v2731_v50 = vpack.c.bf16 %v1285_v48, %v1284_v47  ;;  %v625_v47 = vld [vmem:[#allocation2 + $0x350] sm:$0xff]  ;;  %v626_v48 = vld [vmem:[#allocation2 + $0x358] sm:$0xff] }
  0xfe   :  { %v2572_v51 = vpack.c.bf16 %v626_v48, %v625_v47  ;;  %v724_v48 = vld [vmem:[#allocation2 + $0x3f0] sm:$0xff] }
  0xff   :  { %2516 = vmatpush3.bf16.msra.mxu1 %v2515_v53  ;;  %v1286_v53 = vld [vmem:[#allocation2 + $0x6b0] sm:$0xff] }
 0x100   :  { %2705 = vmatpush3.bf16.msra.mxu0 %v2704_v54  ;;  %2517 = vmatprep.subr.bf16.mxu1 %v2899_v2  ;;  %v1287_v54 = vld [vmem:[#allocation2 + $0x6b8] sm:$0xff] }
 0x101   :  { %2706 = vmatprep.subr.bf16.mxu0 %v2899_v2  ;;  %v2734_v56 = vpack.c.bf16 %v1287_v54, %v1286_v53  ;;  %v627_v53 = vld [vmem:[#allocation2 + $0x360] sm:$0xff]  ;;  %v628_v54 = vld [vmem:[#allocation2 + $0x368] sm:$0xff] }
 0x102   :  { %v2575_v57 = vpack.c.bf16 %v628_v54, %v627_v53 }
 0x103   :  { %2519 = vmatpush3.bf16.msra.mxu1 %v2518_v59  ;;  %v1288_v59 = vld [vmem:[#allocation2 + $0x6c0] sm:$0xff] }
 0x104   :  { %2708 = vmatpush3.bf16.msra.mxu0 %v2707_v60  ;;  %2520 = vmatprep.subr.bf16.mxu1 %v2899_v2  ;;  %v1289_v60 = vld [vmem:[#allocation2 + $0x6c8] sm:$0xff] }
 0x105   :  { %2709 = vmatprep.subr.bf16.mxu0 %v2899_v2  ;;  %v2737_v62 = vpack.c.bf16 %v1289_v60, %v1288_v59  ;;  %v629_v59 = vld [vmem:[#allocation2 + $0x370] sm:$0xff]  ;;  %v630_v60 = vld [vmem:[#allocation2 + $0x378] sm:$0xff] }
 0x106   :  { %v2578_v63 = vpack.c.bf16 %v630_v60, %v629_v59  ;;  %v1563_v60 = vld [vmem:[%s3172_s2] ss:$0 sm:$0xff] }
 0x107   :  { %2522 = vmatpush3.bf16.msra.mxu1 %v2521_v1  ;;  %v1290_v1 = vld [vmem:[#allocation2 + $0x6d0] sm:$0xff] }
 0x108   :  { %2711 = vmatpush3.bf16.msra.mxu0 %v2710_v4  ;;  %2523 = vmatprep.subr.bf16.mxu1 %v2899_v2  ;;  %v1291_v4 = vld [vmem:[#allocation2 + $0x6d8] sm:$0xff] }
 0x109   :  { %2712 = vmatprep.subr.bf16.mxu0 %v2899_v2  ;;  %v2740_v6 = vpack.c.bf16 %v1291_v4, %v1290_v1  ;;  %v710_v4 = vld [vmem:[#allocation2 + $0x380] sm:$0xff] }
 0x10b   :  { %2525 = vmatpush3.bf16.msra.mxu1 %v2524_v10  ;;  %v1292_v10 = vld [vmem:[#allocation2 + $0x6e0] sm:$0xff] }
 0x10c   :  { %2714 = vmatpush3.bf16.msra.mxu0 %v2713_v12  ;;  %2526 = vmatprep.subr.bf16.mxu1 %v2899_v2  ;;  %v1293_v12 = vld [vmem:[#allocation2 + $0x6e8] sm:$0xff] }
 0x10d   :  { %2715 = vmatprep.subr.bf16.mxu0 %v2899_v2  ;;  %v2743_v14 = vpack.c.bf16 %v1293_v12, %v1292_v10  ;;  %v712_v12 = vld [vmem:[#allocation2 + $0x390] sm:$0xff] }
 0x10f   :  { %2528 = vmatpush3.bf16.msra.mxu1 %v2527_v3  ;;  %v616_v3 = vld [vmem:[#allocation2 + $0x308] sm:$0xff] }
 0x110   :  { %2717 = vmatpush3.bf16.msra.mxu0 %v2716_v18  ;;  %2529 = vmatprep.subr.bf16.mxu1 %v2899_v2  ;;  %v1294_v18 = vld [vmem:[#allocation2 + $0x6f0] sm:$0xff]  ;;  %v2557_v20 = vpack.c.bf16 %v616_v3, %v615_v17  ;;  %v1471_v17 = vld [vmem:[#allocation2 + $0x788] sm:$0xff] }
 0x111   :  { %2718 = vmatprep.subr.bf16.mxu0 %v2899_v2  ;;  %v2746_v21 = vpack.c.bf16 %v1295_v19, %v1294_v18  ;;  %v2773_v18 = vpack.c.bf16 %v1471_v17, %v1470_v15  ;;  %v714_v19 = vld [vmem:[#allocation2 + $0x3a0] sm:$0xff] }
 0x113   :  { %2531 = vmatpush3.bf16.msra.mxu1 %v2530_v23  ;;  %v618_v23 = vld [vmem:[#allocation2 + $0x318] sm:$0xff] }
 0x114   :  { %2720 = vmatpush3.bf16.msra.mxu0 %v2719_v24  ;;  %2532 = vmatprep.subr.bf16.mxu1 %v2899_v2  ;;  %v1275_v24 = vpop.permute.xlu0 %1274  ;;  %v2560_v27 = vpack.c.bf16 %v618_v23, %v617_v22  ;;  %v1473_v22 = vld [vmem:[#allocation2 + $0x798] sm:$0xff] }
 0x115   :  { %2721 = vmatprep.subr.bf16.mxu0 %v2899_v2  ;;  %vm1276_vm12 = vcmp.eq.s32.totalorder %v2992_v8, %v1275_v24 }
 0x116   :  { %2025 = vmatmul.mubr.msk.f32.vlgmr.msra.gmra.mrb[0].mxu1 %vm421_vm9, %v2916_v16 }
 0x117   :  { %2534 = vmatpush3.bf16.msra.mxu1 %v2533_v30  ;;  %2059 = vmatprep.mubr.msk.f32.mxu1 %vm2900_vm0, %v2901_v11  ;;  %v620_v30 = vld [vmem:[#allocation2 + $0x328] sm:$0xff] }
 0x118   :  { %2723 = vmatpush3.bf16.msra.mxu0 %v2722_v31  ;;  %2535 = vmatprep.subr.bf16.mxu1 %v2899_v2  ;;  %v1377_v31 = vld [vmem:[#allocation2 + $0x710] sm:$0xff]  ;;  %v2563_v33 = vpack.c.bf16 %v620_v30, %v619_v29  ;;  %v2590_v29 = vpack.c.bf16 %v717_v26, %v716_v25  ;;  %v705_v54 = vpop.permute.xlu0 %704 }
 0x119   :  { %2724 = vmatprep.subr.bf16.mxu0 %v2899_v2  ;;  %v2752_v34 = vpack.c.bf16 %v1378_v32, %v1377_v31  ;;  %v718_v31 = vld [vmem:[#allocation2 + $0x3c0] sm:$0xff]  ;;  %v719_v32 = vld [vmem:[#allocation2 + $0x3c8] sm:$0xff]  ;;  %vm706_vm15 = vcmp.eq.s32.totalorder %v2992_v8, %v705_v54 }
 0x11a   :  { %v2593_v35 = vpack.c.bf16 %v719_v32, %v718_v31 }
 0x11b   :  { %2537 = vmatpush3.bf16.msra.mxu1 %v2536_v37  ;;  %2305 = vmatmul.mubr.msk.f32.vlgmr.msra.gmra.mrb[0].mxu0 %vm1181_vm10, %v2916_v16  ;;  %v1379_v37 = vld [vmem:[#allocation2 + $0x720] sm:$0xff] }
 0x11c   :  { %2726 = vmatpush3.bf16.msra.mxu0 %v2725_v38  ;;  %2538 = vmatprep.subr.bf16.mxu1 %v2899_v2  ;;  %v1380_v38 = vld [vmem:[#allocation2 + $0x728] sm:$0xff] }
 0x11d   :  { %2727 = vmatprep.subr.bf16.mxu0 %v2899_v2  ;;  %2339 = vmatprep.mubr.msk.f32.mxu0 %vm2900_vm0, %v2901_v11  ;;  %v2755_v40 = vpack.c.bf16 %v1380_v38, %v1379_v37  ;;  %v720_v37 = vld [vmem:[#allocation2 + $0x3d0] sm:$0xff]  ;;  %v1478_v38 = vld [vmem:[#allocation2 + $0x7c0] sm:$0xff] }
 0x11f   :  { %2540 = vmatpush3.bf16.msra.mxu1 %v2539_v43  ;;  %v1381_v43 = vld [vmem:[#allocation2 + $0x730] sm:$0xff] }
 0x120   :  { %2729 = vmatpush3.bf16.msra.mxu0 %v2728_v44  ;;  %2541 = vmatprep.subr.bf16.mxu1 %v2899_v2  ;;  %v1382_v44 = vld [vmem:[#allocation2 + $0x738] sm:$0xff] }
 0x121   :  { %2730 = vmatprep.subr.bf16.mxu0 %v2899_v2  ;;  %v2758_v46 = vpack.c.bf16 %v1382_v44, %v1381_v43  ;;  %v723_v43 = vld [vmem:[#allocation2 + $0x3e8] sm:$0xff]  ;;  %v1480_v44 = vld [vmem:[#allocation2 + $0x7d0] sm:$0xff] }
 0x123   :  { %2543 = vmatpush3.bf16.msra.mxu1 %v2542_v49  ;;  %v1383_v49 = vld [vmem:[#allocation2 + $0x740] sm:$0xff] }
 0x124   :  { %2732 = vmatpush3.bf16.msra.mxu0 %v2731_v50  ;;  %2544 = vmatprep.subr.bf16.mxu1 %v2899_v2  ;;  %v1384_v50 = vld [vmem:[#allocation2 + $0x748] sm:$0xff] }
 0x125   :  { %2733 = vmatprep.subr.bf16.mxu0 %v2899_v2  ;;  %v2761_v52 = vpack.c.bf16 %v1384_v50, %v1383_v49  ;;  %v725_v49 = vld [vmem:[#allocation2 + $0x3f8] sm:$0xff]  ;;  %v1482_v50 = vld [vmem:[#allocation2 + $0x7e0] sm:$0xff] }
 0x127   :  { %2546 = vmatpush3.bf16.msra.mxu1 %v2545_v55  ;;  %v1385_v55 = vld [vmem:[#allocation2 + $0x750] sm:$0xff] }
 0x128   :  { %2735 = vmatpush3.bf16.msra.mxu0 %v2734_v56  ;;  %2547 = vmatprep.subr.bf16.mxu1 %v2899_v2  ;;  %v1386_v56 = vld [vmem:[#allocation2 + $0x758] sm:$0xff] }
 0x129   :  { %2736 = vmatprep.subr.bf16.mxu0 %v2899_v2  ;;  %v2764_v58 = vpack.c.bf16 %v1386_v56, %v1385_v55  ;;  %v1484_v55 = vld [vmem:[#allocation2 + $0x7f0] sm:$0xff]  ;;  %v1485_v56 = vld [vmem:[#allocation2 + $0x7f8] sm:$0xff] }
 0x12b   :  { %2549 = vmatpush3.bf16.msra.mxu1 %v2548_v61  ;;  %v1387_v61 = vld [vmem:[#allocation2 + $0x760] sm:$0xff] }
 0x12c   :  { %2738 = vmatpush3.bf16.msra.mxu0 %v2737_v62  ;;  %2550 = vmatprep.subr.bf16.mxu1 %v2899_v2  ;;  %v1388_v62 = vld [vmem:[#allocation2 + $0x768] sm:$0xff] }
 0x12d   :  { %2739 = vmatprep.subr.bf16.mxu0 %v2899_v2  ;;  %v2767_v1 = vpack.c.bf16 %v1388_v62, %v1387_v61 }
 0x12f   :  { %2552 = vmatpush3.bf16.msra.mxu1 %v2551_v5  ;;  %v711_v5 = vld [vmem:[#allocation2 + $0x388] sm:$0xff] }
 0x130   :  { %2741 = vmatpush3.bf16.msra.mxu0 %v2740_v6  ;;  %2553 = vmatprep.subr.bf16.mxu1 %v2899_v2  ;;  %v1389_v6 = vld [vmem:[#allocation2 + $0x770] sm:$0xff]  ;;  %v2581_v9 = vpack.c.bf16 %v711_v5, %v710_v4 }
 0x131   :  { %2742 = vmatprep.subr.bf16.mxu0 %v2899_v2  ;;  %v2770_v10 = vpack.c.bf16 %v1390_v7, %v1389_v6 }
 0x133   :  { %2555 = vmatpush3.bf16.msra.mxu1 %v2554_v13  ;;  %v713_v13 = vld [vmem:[#allocation2 + $0x398] sm:$0xff] }
 0x134   :  { %2744 = vmatpush3.bf16.msra.mxu0 %v2743_v14  ;;  %2556 = vmatprep.subr.bf16.mxu1 %v2899_v2  ;;  %v1370_v14 = vpop.permute.xlu1 %1369  ;;  %v2584_v3 = vpack.c.bf16 %v713_v13, %v712_v12 }
 0x135   :  { %2745 = vmatprep.subr.bf16.mxu0 %v2899_v2  ;;  %vm1371_vm14 = vcmp.eq.s32.totalorder %v2992_v8, %v1370_v14 }
 0x136   :  { %2060 = vmatmul.mubr.msk.f32.vlgmr.msra.gmra.mrb[0].mxu1 %vm516_vm11, %v2916_v16 }
 0x137   :  { %2558 = vmatpush3.bf16.msra.mxu1 %v2557_v20  ;;  %2094 = vmatprep.mubr.msk.f32.mxu1 %vm2900_vm0, %v2901_v11  ;;  %v715_v20 = vld [vmem:[#allocation2 + $0x3a8] sm:$0xff] }
 0x138   :  { %2747 = vmatpush3.bf16.msra.mxu0 %v2746_v21  ;;  %2559 = vmatprep.subr.bf16.mxu1 %v2899_v2  ;;  %v1472_v21 = vld [vmem:[#allocation2 + $0x790] sm:$0xff]  ;;  %v2587_v23 = vpack.c.bf16 %v715_v20, %v714_v19 }
 0x139   :  { %2748 = vmatprep.subr.bf16.mxu0 %v2899_v2  ;;  %v2776_v24 = vpack.c.bf16 %v1473_v22, %v1472_v21 }
 0x13b   :  { %2561 = vmatpush3.bf16.msra.mxu1 %v2560_v27  ;;  %2340 = vmatmul.mubr.msk.f32.vlgmr.msra.gmra.mrb[0].mxu0 %vm1276_vm12, %v2916_v16  ;;  %v1474_v27 = vld [vmem:[#allocation2 + $0x7a0] sm:$0xff] }
 0x13c   :  { %2750 = vmatpush3.bf16.msra.mxu0 %v2749_v28  ;;  %2562 = vmatprep.subr.bf16.mxu1 %v2899_v2  ;;  %v1475_v28 = vld [vmem:[#allocation2 + $0x7a8] sm:$0xff] }
 0x13d   :  { %2751 = vmatprep.subr.bf16.mxu0 %v2899_v2  ;;  %2374 = vmatprep.mubr.msk.f32.mxu0 %vm2900_vm0, %v2901_v11  ;;  %v2779_v30 = vpack.c.bf16 %v1475_v28, %v1474_v27 }
 0x13f   :  { %2564 = vmatpush3.bf16.msra.mxu1 %v2563_v33  ;;  %v1476_v33 = vld [vmem:[#allocation2 + $0x7b0] sm:$0xff] }
 0x140   :  { %2753 = vmatpush3.bf16.msra.mxu0 %v2752_v34  ;;  %2565 = vmatprep.subr.bf16.mxu1 %v2899_v2  ;;  %v1477_v34 = vld [vmem:[#allocation2 + $0x7b8] sm:$0xff] }
 0x141   :  { %2754 = vmatprep.subr.bf16.mxu0 %v2899_v2  ;;  %v2782_v36 = vpack.c.bf16 %v1477_v34, %v1476_v33 }
 0x143   :  { %2567 = vmatpush3.bf16.msra.mxu1 %v2566_v39  ;;  %v1479_v39 = vld [vmem:[#allocation2 + $0x7c8] sm:$0xff] }
 0x144   :  { %2756 = vmatpush3.bf16.msra.mxu0 %v2755_v40  ;;  %2568 = vmatprep.subr.bf16.mxu1 %v2899_v2  ;;  %v2785_v41 = vpack.c.bf16 %v1479_v39, %v1478_v38 }
 0x145   :  { %2757 = vmatprep.subr.bf16.mxu0 %v2899_v2 }
 0x147   :  { %2570 = vmatpush3.bf16.msra.mxu1 %v2569_v45  ;;  %v1481_v45 = vld [vmem:[#allocation2 + $0x7d8] sm:$0xff] }
 0x148   :  { %2759 = vmatpush3.bf16.msra.mxu0 %v2758_v46  ;;  %2571 = vmatprep.subr.bf16.mxu1 %v2899_v2  ;;  %v2599_v46 = vpack.c.bf16 %v723_v43, %v722_v42  ;;  %v2788_v47 = vpack.c.bf16 %v1481_v45, %v1480_v44 }
 0x149   :  { %2760 = vmatprep.subr.bf16.mxu0 %v2899_v2 }
 0x14b   :  { %2573 = vmatpush3.bf16.msra.mxu1 %v2572_v51  ;;  %v1483_v51 = vld [vmem:[#allocation2 + $0x7e8] sm:$0xff] }
 0x14c   :  { %2762 = vmatpush3.bf16.msra.mxu0 %v2761_v52  ;;  %2574 = vmatprep.subr.bf16.mxu1 %v2899_v2  ;;  %v2602_v52 = vpack.c.bf16 %v725_v49, %v724_v48  ;;  %v2791_v53 = vpack.c.bf16 %v1483_v51, %v1482_v50 }
 0x14d   :  { %2763 = vmatprep.subr.bf16.mxu0 %v2899_v2 }
 0x14f   :  { %2576 = vmatpush3.bf16.msra.mxu1 %v2575_v57  ;;  %v2794_v57 = vpack.c.bf16 %v1485_v56, %v1484_v55 }
 0x150   :  { %2765 = vmatpush3.bf16.msra.mxu0 %v2764_v58  ;;  %2577 = vmatprep.subr.bf16.mxu1 %v2899_v2  ;;  %v1465_v58 = vpop.permute.xlu1 %1464 }
 0x151   :  { %2766 = vmatprep.subr.bf16.mxu0 %v2899_v2 }
 0x153   :  { %2579 = vmatpush3.bf16.msra.mxu1 %v2578_v63 }
 0x154   :  { %2768 = vmatpush3.bf16.msra.mxu0 %v2767_v1  ;;  %2580 = vmatprep.subr.bf16.mxu1 %v2899_v2 }
 0x155   :  { %2769 = vmatprep.subr.bf16.mxu0 %v2899_v2 }
 0x156   :  { %2095 = vmatmul.mubr.msk.f32.vlgmr.msra.gmra.mrb[0].mxu1 %vm611_vm13, %v2916_v16 }
 0x157   :  { %2582 = vmatpush3.bf16.msra.mxu1 %v2581_v9  ;;  %2129 = vmatprep.mubr.msk.f32.mxu1 %vm2900_vm0, %v2901_v11 }
 0x158   :  { %2771 = vmatpush3.bf16.msra.mxu0 %v2770_v10  ;;  %2583 = vmatprep.subr.bf16.mxu1 %v2899_v2 }
 0x159   :  { %2772 = vmatprep.subr.bf16.mxu0 %v2899_v2 }
 0x15b   :  { %2585 = vmatpush3.bf16.msra.mxu1 %v2584_v3  ;;  %2375 = vmatmul.mubr.msk.f32.vlgmr.msra.gmra.mrb[0].mxu0 %vm1371_vm14, %v2916_v16 }
 0x15c   :  { %2774 = vmatpush3.bf16.msra.mxu0 %v2773_v18  ;;  %2586 = vmatprep.subr.bf16.mxu1 %v2899_v2 }
 0x15d   :  { %2775 = vmatprep.subr.bf16.mxu0 %v2899_v2  ;;  %2409 = vmatprep.mubr.msk.f32.mxu0 %vm2900_vm0, %v2901_v11  ;;  %v721_v11 = vld [vmem:[#allocation2 + $0x3d8] sm:$0xff]  ;;  %vm1466_vm0 = vcmp.eq.s32.totalorder %v2992_v8, %v1465_v58 }
 0x15e   :  { %v2596_v40 = vpack.c.bf16 %v721_v11, %v720_v37 }
 0x15f   :  { %2588 = vmatpush3.bf16.msra.mxu1 %v2587_v23 }
 0x160   :  { %2777 = vmatpush3.bf16.msra.mxu0 %v2776_v24  ;;  %2589 = vmatprep.subr.bf16.mxu1 %v2899_v2 }
 0x161   :  { %2778 = vmatprep.subr.bf16.mxu0 %v2899_v2 }
 0x163   :  { %2591 = vmatpush3.bf16.msra.mxu1 %v2590_v29 }
 0x164   :  { %2780 = vmatpush3.bf16.msra.mxu0 %v2779_v30  ;;  %2592 = vmatprep.subr.bf16.mxu1 %v2899_v2 }
 0x165   :  { %2781 = vmatprep.subr.bf16.mxu0 %v2899_v2 }
 0x167   :  { %2594 = vmatpush3.bf16.msra.mxu1 %v2593_v35 }
 0x168   :  { %2783 = vmatpush3.bf16.msra.mxu0 %v2782_v36  ;;  %2595 = vmatprep.subr.bf16.mxu1 %v2899_v2 }
 0x169   :  { %2784 = vmatprep.subr.bf16.mxu0 %v2899_v2 }
 0x16b   :  { %2597 = vmatpush3.bf16.msra.mxu1 %v2596_v40 }
 0x16c   :  { %2786 = vmatpush3.bf16.msra.mxu0 %v2785_v41  ;;  %2598 = vmatprep.subr.bf16.mxu1 %v2899_v2 }
 0x16d   :  { %2787 = vmatprep.subr.bf16.mxu0 %v2899_v2 }
 0x16f   :  { %2600 = vmatpush3.bf16.msra.mxu1 %v2599_v46 }
 0x170   :  { %2789 = vmatpush3.bf16.msra.mxu0 %v2788_v47  ;;  %2601 = vmatprep.subr.bf16.mxu1 %v2899_v2 }
 0x171   :  { %2790 = vmatprep.subr.bf16.mxu0 %v2899_v2 }
 0x173   :  { %2603 = vmatpush3.bf16.msra.mxu1 %v2602_v52 }
 0x174   :  { %2792 = vmatpush3.bf16.msra.mxu0 %v2791_v53 }
 0x175   :  { %2793 = vmatprep.subr.bf16.mxu0 %v2899_v2 }
 0x176   :  { %2130 = vmatmul.mubr.msk.f32.vlgmr.msra.gmra.mrb[0].mxu1 %vm706_vm15, %v2916_v16 }
 0x178   :  { %2795 = vmatpush3.bf16.msra.mxu0 %v2794_v57 }
 0x17b   :  { %2410 = vmatmul.mubr.msk.f32.vlgmr.msra.gmra.mrb[0].mxu0 %vm1466_vm0, %v2916_v16 }
 0x249   :  { %v792_v59 = vpop.f32.mrb[0].mxu1 }
 0x24a   :  { %v2131_v61 = vpop.f32.mrb[1].mxu1  ;;  %v2798_v62 = vadd.f32 %v1563_v60, %v792_v59 }
 0x24e   :  { %v1552_v63 = vpop.f32.mrb[0].mxu0 }
 0x24f   :  { %v2801_v0 = vadd.f32 %v2798_v62, %v1552_v63  ;;  %v2411_v1 = vpop.f32.mrb[1].mxu0 }
 0x251   :  { %1557 = vst [vmem:[%s3173_s3] sm:$0xff] %v2801_v0 }
 0x252   :  { %1562 = vsyncpa [#allocation3], 1 }

</bundles_post_ra>
